<compile_context>
chip_gen: v5e
topology: v5e:2x2
jax: 0.10.0
libtpu: 0.0.40
codegen_flags: <defaults>
</compile_context>

<pallas_src>
import jax
import jax.numpy as jnp
from jax.experimental import pallas as pl
from jax.experimental.pallas import tpu as pltpu


def _round_up(x, m):
    return (x + m - 1) // m * m


def _pick_item_tile(np_padded, max_tile=512):
    """Largest multiple of 128 that divides np_padded and is <= max_tile."""
    m = np_padded // 128
    best = 1
    d = 1
    while d * d <= m:
        if m % d == 0:
            for cand in (d, m // d):
                if cand * 128 <= max_tile and cand > best:
                    best = cand
        d += 1
    return best * 128


def _sigmoid(x):
    # 0.5*(tanh(0.5x)+1): single EUP transcendental instead of exp + divide.
    return 0.5 * (jnp.tanh(0.5 * x) + 1.0)


def uae_kernel(x_ref, we_ref, be_ref, wd_ref, bd_ref, out_ref, z_ref, z_acc):
    j = pl.program_id(1)
    nt = pl.num_programs(1) // 2  # number of item tiles (inner axis = 2*nt)

    # ---------------- Phase 1: encoder K-accumulation --------------------
    @pl.when(j < nt)
    def _encoder_step():
        @pl.when(j == 0)
        def _init():
            z_acc[...] = jnp.zeros_like(z_acc)

        x = x_ref[...].astype(we_ref.dtype)  # feed MXU in the weight dtype
        z_acc[...] += jnp.dot(x, we_ref[...], preferred_element_type=jnp.float32)

        @pl.when(j == nt - 1)
        def _finish_encoder():
            z = _sigmoid(z_acc[...] + be_ref[...].astype(jnp.float32))
            z_acc[...] = z                      # f32 copy reused by the decoder
            z_ref[...] = z.astype(z_ref.dtype)  # latent output block (lane-dense)

    # ---------------- Phase 2: decoder, one item tile per step -----------
    @pl.when(j >= nt)
    def _decoder_step():
        z = z_acc[...].astype(wd_ref.dtype)
        pre = jnp.dot(z, wd_ref[...], preferred_element_type=jnp.float32)
        out = _sigmoid(pre + bd_ref[...].astype(jnp.float32))
        out_ref[...] = out.astype(out_ref.dtype)


def prepare_uae_params(w_enc, b_enc, w_dec, b_dec, *, compute_dtype=None):
    """One-time param prep (do NOT do this per forward call).

    Takes PyTorch nn.Linear layout:
      w_enc: (latent, num_items), b_enc: (latent,)
      w_dec: (num_items, latent), b_dec: (num_items,)
    Returns pre-transposed, zero-padded (latent & num_items -> multiples of 128),
    optionally dtype-cast parameters.
    """
    latent, num_items = w_enc.shape
    Lp = _round_up(latent, 128)
    Np = _round_up(num_items, 128)
    dt = compute_dtype if compute_dtype is not None else w_enc.dtype

    we = jnp.zeros((Np, Lp), dt).at[:num_items, :latent].set(w_enc.T.astype(dt))
    be = jnp.zeros((1, Lp), dt).at[0, :latent].set(b_enc.astype(dt))
    wd = jnp.zeros((Lp, Np), dt).at[:latent, :num_items].set(w_dec.T.astype(dt))
    bd = jnp.zeros((1, Np), dt).at[0, :num_items].set(b_dec.astype(dt))
    return dict(w_enc=we, b_enc=be, w_dec=wd, b_dec=bd,
                latent_dim=latent, num_items=num_items)


def uae_forward(x, params, *, tile_b=None, tile_n=None):
    """x: (B, num_items) float. Returns (output (B, num_items), z (B, latent))."""
    B, num_items = x.shape
    assert num_items == params["num_items"], "x feature dim != num_items"
    we, be, wd, bd = params["w_enc"], params["b_enc"], params["w_dec"], params["b_dec"]
    Np, Lp = we.shape
    latent = params["latent_dim"]

    # Item tile (also the encoder K tile): lane-dense, multiple of 128, divides Np.
    if tile_n is None:
        tile_n = _pick_item_tile(Np, max_tile=512)
    assert tile_n % 128 == 0 and Np % tile_n == 0
    nt = Np // tile_n

    # Batch tile: a real tile (not the whole batch) so the grid has multiple
    # steps -> DMA/compute overlap and v7x dual-core sharding on the batch axis.
    if tile_b is None:
        tile_b = min(256, _round_up(B, 8))
    tile_b = min(_round_up(tile_b, 8), _round_up(B, 8))
    Bp = _round_up(B, tile_b)
    nb = Bp // tile_b

    xp = x
    if (Bp, Np) != x.shape:
        xp = jnp.pad(x, ((0, Bp - B), (0, Np - num_items)))

    grid = (nb, 2 * nt)

    # Index maps: clamp so phase-2 steps keep the last encoder tile resident
    # (no redundant re-fetch) and phase-1 steps hold the first decoder tile.
    x_map   = lambda i, j: (i, jnp.minimum(j, nt - 1))
    we_map  = lambda i, j: (jnp.minimum(j, nt - 1), 0)
    be_map  = lambda i, j: (0, 0)
    wd_map  = lambda i, j: (0, jnp.maximum(j - nt, 0))
    bd_map  = lambda i, j: (0, jnp.maximum(j - nt, 0))
    out_map = lambda i, j: (i, jnp.maximum(j - nt, 0))
    z_map   = lambda i, j: (i, 0)

    out_p, z_p = pl.pallas_call(
        uae_kernel,
        out_shape=(
            jax.ShapeDtypeStruct((Bp, Np), x.dtype),   # output (padded)
            jax.ShapeDtypeStruct((Bp, Lp), x.dtype),   # z (padded)
        ),
        grid_spec=pltpu.PrefetchScalarGridSpec(
            num_scalar_prefetch=0,
            grid=grid,
            in_specs=[
                pl.BlockSpec((tile_b, tile_n), x_map),    # x K-tile
                pl.BlockSpec((tile_n, Lp), we_map),       # W_enc K-tile
                pl.BlockSpec((1, Lp), be_map),            # b_enc (invariant, tiny)
                pl.BlockSpec((Lp, tile_n), wd_map),       # W_dec N-tile
                pl.BlockSpec((1, tile_n), bd_map),        # b_dec N-tile
            ],
            out_specs=[
                pl.BlockSpec((tile_b, tile_n), out_map),  # output N-tile
                pl.BlockSpec((tile_b, Lp), z_map),        # z (resident per batch tile)
            ],
            scratch_shapes=[pltpu.VMEM((tile_b, Lp), jnp.float32)],  # z accumulator
        ),
        compiler_params=pltpu.CompilerParams(
            dimension_semantics=("parallel", "arbitrary"),
            vmem_limit_bytes=48 * 1024 * 1024,
        ),
    )(xp, we, be, wd, bd)

    return out_p[:B, :num_items], z_p[:B, :latent]


if __name__ == "__main__":
    # Small shapes, deliberately ragged to exercise padding + multi-step grid.
    num_users = 100      # unused in forward (kept for parity with the module)
    num_items = 1000     # not a multiple of 128 -> padded to 1024 internally
    latent_dim = 50      # PyTorch default -> lane-padded to 128 internally
    batch = 200

    key = jax.random.PRNGKey(0)
    kx, k1, k2, k3, k4 = jax.random.split(key, 5)

    # nn.Linear-style init, PyTorch layout (out_features, in_features).
    be_bound = 1.0 / (num_items ** 0.5)
    bd_bound = 1.0 / (latent_dim ** 0.5)
    w_enc = jax.random.uniform(k1, (latent_dim, num_items), jnp.float32, -be_bound, be_bound)
    b_enc = jax.random.uniform(k2, (latent_dim,), jnp.float32, -be_bound, be_bound)
    w_dec = jax.random.uniform(k3, (num_items, latent_dim), jnp.float32, -bd_bound, bd_bound)
    b_dec = jax.random.uniform(k4, (num_items,), jnp.float32, -bd_bound, bd_bound)

    x = jax.random.uniform(kx, (batch, num_items), jnp.float32)

    # Pure-JAX reference.
    z_ref = jax.nn.sigmoid(x @ w_enc.T + b_enc)
    out_ref = jax.nn.sigmoid(z_ref @ w_dec.T + b_dec)

    # f32 path: small tile_b so the grid has several steps on both axes.
    params_f32 = prepare_uae_params(w_enc, b_enc, w_dec, b_dec)
    out, z = uae_forward(x, params_f32, tile_b=64, tile_n=512)
    jax.block_until_ready((out, z))

    assert out.shape == (batch, num_items) and z.shape == (batch, latent_dim)
    assert jnp.allclose(z, z_ref, atol=2e-5, rtol=2e-5)
    assert jnp.allclose(out, out_ref, atol=2e-5, rtol=2e-5)

    # bf16-weight path (halves HBM weight bytes; f32 accumulation inside kernel).
    params_bf16 = prepare_uae_params(w_enc, b_enc, w_dec, b_dec,
                                     compute_dtype=jnp.bfloat16)
    out16, z16 = uae_forward(x, params_bf16)
    jax.block_until_ready((out16, z16))
    assert jnp.allclose(z16, z_ref, atol=2e-2)
    assert jnp.allclose(out16, out_ref, atol=2e-2)

    print("KERNEL_OK")
</pallas_src>

<mosaic_0001>
module attributes {stable_mosaic.version = 11 : i64} {
  func.func @uae_kernel(%arg0: i32, %arg1: i32, %arg2: memref<64x512xf32, #tpu.memory_space<vmem>>, %arg3: memref<512x128xf32, #tpu.memory_space<vmem>>, %arg4: memref<1x128xf32, #tpu.memory_space<vmem>>, %arg5: memref<128x512xf32, #tpu.memory_space<vmem>>, %arg6: memref<1x512xf32, #tpu.memory_space<vmem>>, %arg7: memref<64x512xf32, #tpu.memory_space<vmem>>, %arg8: memref<64x128xf32, #tpu.memory_space<vmem>>, %arg9: memref<64x128xf32, #tpu.memory_space<vmem>>) attributes {dimension_semantics = [#tpu.dimension_semantics<parallel>, #tpu.dimension_semantics<arbitrary>], iteration_bounds = array<i64: 4, 4>, scalar_prefetch = 0 : i64, scratch_operands = 1 : i64, tpu.core_type = #tpu.core_type<tc>, window_params = [{transform_indices = @transform_0, window_bounds = array<i64: 64, 512>}, {transform_indices = @transform_1, window_bounds = array<i64: 512, 128>}, {pipeline_mode = #tpu.pipeline_mode<synchronous>, transform_indices = @transform_2, window_bounds = array<i64: 1, 128>}, {transform_indices = @transform_3, window_bounds = array<i64: 128, 512>}, {transform_indices = @transform_4, window_bounds = array<i64: 1, 512>}, {transform_indices = @transform_5, window_bounds = array<i64: 64, 512>}, {transform_indices = @transform_6, window_bounds = array<i64: 64, 128>}]} {
    %c2_i32 = arith.constant 2 : i32
    %0 = arith.cmpi slt, %arg1, %c2_i32 : i32
    %1 = arith.extui %0 : i1 to i32
    %c0_i32 = arith.constant 0 : i32
    %2 = arith.cmpi ne, %1, %c0_i32 : i32
    scf.if %2 {
      %c0_i32_2 = arith.constant 0 : i32
      %6 = arith.cmpi eq, %arg1, %c0_i32_2 : i32
      %7 = arith.extui %6 : i1 to i32
      %c0_i32_3 = arith.constant 0 : i32
      %8 = arith.cmpi ne, %7, %c0_i32_3 : i32
      scf.if %8 {
        %cst_12 = arith.constant 0.000000e+00 : f32
        %18 = vector.broadcast %cst_12 : f32 to vector<64x128xf32>
        %c0_13 = arith.constant 0 : index
        %c0_14 = arith.constant 0 : index
        %19 = vector.load %arg9[%c0_13, %c0_14] : memref<64x128xf32, #tpu.memory_space<vmem>>, vector<64x128xf32>
        tpu.vector_store %arg9[%c0_13, %c0_14], %18 {strides = array<i32>} : memref<64x128xf32, #tpu.memory_space<vmem>>, vector<64x128xf32>,
      } else {
      }
      %c0 = arith.constant 0 : index
      %c0_4 = arith.constant 0 : index
      %9 = vector.load %arg2[%c0, %c0_4] : memref<64x512xf32, #tpu.memory_space<vmem>>, vector<64x512xf32>
      %c0_5 = arith.constant 0 : index
      %c0_6 = arith.constant 0 : index
      %10 = vector.load %arg9[%c0_5, %c0_6] : memref<64x128xf32, #tpu.memory_space<vmem>>, vector<64x128xf32>
      %c0_7 = arith.constant 0 : index
      %c0_8 = arith.constant 0 : index
      %11 = vector.load %arg3[%c0_7, %c0_8] : memref<512x128xf32, #tpu.memory_space<vmem>>, vector<512x128xf32>
      %cst = arith.constant dense<0.000000e+00> : vector<64x128xf32>
      %12 = tpu.matmul %9, %11, %cst {dimension_numbers = #tpu.dot_dimension_numbers<[1], [0], [0], [1], [0, 0, 1, 1], [], []>} : vector<64x512xf32>, vector<512x128xf32>, vector<64x128xf32> -> vector<64x128xf32>
      %13 = arith.addf %10, %12 : vector<64x128xf32>
      %c0_9 = arith.constant 0 : index
      %c0_10 = arith.constant 0 : index
      %14 = vector.load %arg9[%c0_9, %c0_10] : memref<64x128xf32, #tpu.memory_space<vmem>>, vector<64x128xf32>
      tpu.vector_store %arg9[%c0_9, %c0_10], %13 {strides = array<i32>} : memref<64x128xf32, #tpu.memory_space<vmem>>, vector<64x128xf32>,
      %c1_i32 = arith.constant 1 : i32
      %15 = arith.cmpi eq, %arg1, %c1_i32 : i32
      %16 = arith.extui %15 : i1 to i32
      %c0_i32_11 = arith.constant 0 : i32
      %17 = arith.cmpi ne, %16, %c0_i32_11 : i32
      scf.if %17 {
        %c0_12 = arith.constant 0 : index
        %c0_13 = arith.constant 0 : index
        %18 = vector.load %arg9[%c0_12, %c0_13] : memref<64x128xf32, #tpu.memory_space<vmem>>, vector<64x128xf32>
        %c0_14 = arith.constant 0 : index
        %c0_15 = arith.constant 0 : index
        %19 = vector.load %arg4[%c0_14, %c0_15] : memref<1x128xf32, #tpu.memory_space<vmem>>, vector<1x128xf32>
        %20 = vector.broadcast %19 : vector<1x128xf32> to vector<64x128xf32>
        %21 = arith.addf %18, %20 : vector<64x128xf32>
        %cst_16 = arith.constant 5.000000e-01 : f32
        %22 = vector.broadcast %cst_16 : f32 to vector<64x128xf32>
        %23 = arith.mulf %22, %21 : vector<64x128xf32>
        %24 = math.tanh %23 : vector<64x128xf32>
        %cst_17 = arith.constant 1.000000e+00 : f32
        %25 = vector.broadcast %cst_17 : f32 to vector<64x128xf32>
        %26 = arith.addf %24, %25 : vector<64x128xf32>
        %cst_18 = arith.constant 5.000000e-01 : f32
        %27 = vector.broadcast %cst_18 : f32 to vector<64x128xf32>
        %28 = arith.mulf %27, %26 : vector<64x128xf32>
        %c0_19 = arith.constant 0 : index
        %c0_20 = arith.constant 0 : index
        %29 = vector.load %arg9[%c0_19, %c0_20] : memref<64x128xf32, #tpu.memory_space<vmem>>, vector<64x128xf32>
        tpu.vector_store %arg9[%c0_19, %c0_20], %28 {strides = array<i32>} : memref<64x128xf32, #tpu.memory_space<vmem>>, vector<64x128xf32>,
        %c0_21 = arith.constant 0 : index
        %c0_22 = arith.constant 0 : index
        %30 = vector.load %arg8[%c0_21, %c0_22] : memref<64x128xf32, #tpu.memory_space<vmem>>, vector<64x128xf32>
        tpu.vector_store %arg8[%c0_21, %c0_22], %28 {strides = array<i32>} : memref<64x128xf32, #tpu.memory_space<vmem>>, vector<64x128xf32>,
      } else {
      }
    } else {
    }
    %c2_i32_0 = arith.constant 2 : i32
    %3 = arith.cmpi sge, %arg1, %c2_i32_0 : i32
    %4 = arith.extui %3 : i1 to i32
    %c0_i32_1 = arith.constant 0 : i32
    %5 = arith.cmpi ne, %4, %c0_i32_1 : i32
    scf.if %5 {
      %c0 = arith.constant 0 : index
      %c0_2 = arith.constant 0 : index
      %6 = vector.load %arg9[%c0, %c0_2] : memref<64x128xf32, #tpu.memory_space<vmem>>, vector<64x128xf32>
      %c0_3 = arith.constant 0 : index
      %c0_4 = arith.constant 0 : index
      %7 = vector.load %arg5[%c0_3, %c0_4] : memref<128x512xf32, #tpu.memory_space<vmem>>, vector<128x512xf32>
      %cst = arith.constant dense<0.000000e+00> : vector<64x512xf32>
      %8 = tpu.matmul %6, %7, %cst {dimension_numbers = #tpu.dot_dimension_numbers<[1], [0], [0], [1], [0, 0, 1, 1], [], []>} : vector<64x128xf32>, vector<128x512xf32>, vector<64x512xf32> -> vector<64x512xf32>
      %c0_5 = arith.constant 0 : index
      %c0_6 = arith.constant 0 : index
      %9 = vector.load %arg6[%c0_5, %c0_6] : memref<1x512xf32, #tpu.memory_space<vmem>>, vector<1x512xf32>
      %10 = vector.broadcast %9 : vector<1x512xf32> to vector<64x512xf32>
      %11 = arith.addf %8, %10 : vector<64x512xf32>
      %cst_7 = arith.constant 5.000000e-01 : f32
      %12 = vector.broadcast %cst_7 : f32 to vector<64x512xf32>
      %13 = arith.mulf %12, %11 : vector<64x512xf32>
      %14 = math.tanh %13 : vector<64x512xf32>
      %cst_8 = arith.constant 1.000000e+00 : f32
      %15 = vector.broadcast %cst_8 : f32 to vector<64x512xf32>
      %16 = arith.addf %14, %15 : vector<64x512xf32>
      %cst_9 = arith.constant 5.000000e-01 : f32
      %17 = vector.broadcast %cst_9 : f32 to vector<64x512xf32>
      %18 = arith.mulf %17, %16 : vector<64x512xf32>
      %c0_10 = arith.constant 0 : index
      %c0_11 = arith.constant 0 : index
      %19 = vector.load %arg7[%c0_10, %c0_11] : memref<64x512xf32, #tpu.memory_space<vmem>>, vector<64x512xf32>
      tpu.vector_store %arg7[%c0_10, %c0_11], %18 {strides = array<i32>} : memref<64x512xf32, #tpu.memory_space<vmem>>, vector<64x512xf32>,
    } else {
    }
    return
  }
  func.func @transform_0(%arg0: i32, %arg1: i32) -> (i32, i32) {
    %c1_i32 = arith.constant 1 : i32
    %0 = arith.minsi %arg1, %c1_i32 : i32
    %c0_i32 = arith.constant 0 : i32
    return %arg0, %0 : i32, i32
  }
  func.func @transform_1(%arg0: i32, %arg1: i32) -> (i32, i32) {
    %c1_i32 = arith.constant 1 : i32
    %0 = arith.minsi %arg1, %c1_i32 : i32
    %c0_i32 = arith.constant 0 : i32
    %c0_i32_0 = arith.constant 0 : i32
    return %0, %c0_i32 : i32, i32
  }
  func.func @transform_2(%arg0: i32, %arg1: i32) -> (i32, i32) {
    %c0_i32 = arith.constant 0 : i32
    %c0_i32_0 = arith.constant 0 : i32
    %c0_i32_1 = arith.constant 0 : i32
    return %c0_i32, %c0_i32_0 : i32, i32
  }
  func.func @transform_3(%arg0: i32, %arg1: i32) -> (i32, i32) {
    %c2_i32 = arith.constant 2 : i32
    %0 = arith.subi %arg1, %c2_i32 : i32
    %c0_i32 = arith.constant 0 : i32
    %1 = arith.maxsi %0, %c0_i32 : i32
    %c0_i32_0 = arith.constant 0 : i32
    %c0_i32_1 = arith.constant 0 : i32
    return %c0_i32_0, %1 : i32, i32
  }
  func.func @transform_4(%arg0: i32, %arg1: i32) -> (i32, i32) {
    %c2_i32 = arith.constant 2 : i32
    %0 = arith.subi %arg1, %c2_i32 : i32
    %c0_i32 = arith.constant 0 : i32
    %1 = arith.maxsi %0, %c0_i32 : i32
    %c0_i32_0 = arith.constant 0 : i32
    %c0_i32_1 = arith.constant 0 : i32
    return %c0_i32_0, %1 : i32, i32
  }
  func.func @transform_5(%arg0: i32, %arg1: i32) -> (i32, i32) {
    %c2_i32 = arith.constant 2 : i32
    %0 = arith.subi %arg1, %c2_i32 : i32
    %c0_i32 = arith.constant 0 : i32
    %1 = arith.maxsi %0, %c0_i32 : i32
    %c0_i32_0 = arith.constant 0 : i32
    return %arg0, %1 : i32, i32
  }
  func.func @transform_6(%arg0: i32, %arg1: i32) -> (i32, i32) {
    %c0_i32 = arith.constant 0 : i32
    %c0_i32_0 = arith.constant 0 : i32
    return %arg0, %c0_i32 : i32, i32
  }
}

</mosaic_0001>

<bundles_post_ra>
// kernel: tpu_custom_call.1
= control target key start
LH: loop header
LB: loop body
LE: loop exit
PB: predicated region body
PF: predicated region fallthrough
CT: control target
= control target key end

     0   :  { %s2933_s0 = inlined_call_operand.hbm [shape: f32[256,1024], index: 0, kind: input, shape index: {}]   ;;  %s2934_s1 = inlined_call_operand.hbm [shape: f32[1024,128], index: 1, kind: input, shape index: {}]   ;;  %s2935_s2 = inlined_call_operand.vmem [shape: f32[1,128], index: 2, kind: input, shape index: {}]   ;;  %s2936_s3 = inlined_call_operand.hbm [shape: f32[128,1024], index: 3, kind: input, shape index: {}]   ;;  %s2937_s4 = inlined_call_operand.hbm [shape: f32[1,1024], index: 4, kind: input, shape index: {}]   ;;  %s2938_s5 = inlined_call_operand.hbm [shape: f32[256,1024], index: 5, kind: output, shape index: {0}]   ;;  %s2939_s6 = inlined_call_operand.hbm [shape: f32[256,128], index: 6, kind: output, shape index: {1}]  }
   0x1   :  { %2973 = sst [smem:[#allocation44_spill]] %s2933_s0 }
   0x2   :  { %2974 = sst [smem:[#allocation45_spill]] %s2934_s1 }
   0x3   :  { %2975 = sst [smem:[#allocation46_spill]] %s2935_s2 }
   0x4   :  { %2976 = sst [smem:[#allocation47_spill]] %s2936_s3 }
   0x5   :  { %2977 = sst [smem:[#allocation48_spill]] %s2937_s4 }
   0x6   :  { %2978 = sst [smem:[#allocation49_spill]] %s2938_s5 }
   0x7   :  { %2979 = sst [smem:[#allocation50_spill]] %s2939_s6 }
   0x8   :  { %12 = vsyncpa [#allocation4], 0 }
   0x9   :  { %14 = vsyncpa [#allocation4 + $0x1], 0 }
   0xa   :  { %15 = vsyncpa [#allocation7], 0 }
   0xb   :  { %17 = vsyncpa [#allocation7 + $0x1], 0 }
   0xc   :  { %18 = vsyncpa [#allocation10], 0 }
   0xd   :  { %20 = vsyncpa [#allocation10 + $0x1], 0 }
   0xe   :  { %21 = vsyncpa [#allocation5], 0 }
   0xf   :  { %23 = vsyncpa [#allocation5 + $0x1], 0 }
  0x10   :  { %24 = vsyncpa [#allocation13], 0 }
  0x11   :  { %26 = vsyncpa [#allocation13 + $0x1], 0  ;;  %s2238_s21 = smov 0   ;;  %s2240_s22 = smov 0  }
  0x12   :  { %s2242_s23 = smov 0   ;;  %s2244_s24 = smov 0  }
  0x13   :  { %s2246_s25 = smov 0   ;;  %s2248_s26 = smov 0  }
  0x14   :  { %s2250_s27 = smov 0   ;;  %s2252_s28 = smov 0  }
  0x15   :  { %s2254_s29 = smov 0   ;;  %s2256_s30 = smov 0  }
  0x16   :  { %s2258_s7 = smov 0   ;;  %s2260_s8 = smov 0  }
  0x17   :  { %s2262_s9 = smov 0   ;;  %s2264_s10 = smov 0  }
  0x18   :  { %s2266_s11 = smov 0   ;;  %s2268_s12 = smov 0  }
  0x19   :  { %s2270_s13 = smov 0   ;;  %s2272_s14 = smov 0  }
  0x1a   :  { %s2274_s15 = smov 0   ;;  %s2276_s16 = smov 0  }
  0x1b LB: > { %2980 = sst [smem:[#allocation20_spill]] %s2114_s21  ;;  %s2337_s17 = sadd.s32 4294967295, %s2190_s16   ;;  %s2190_s16 = sphi %s2276_s16, %s32_s16   ;;  %s2186_s15 = sphi %s2274_s15, %s3074_s15   ;;  %s2182_s14 = sphi %s2272_s14, %s3085_s14   ;;  %s2178_s13 = sphi %s2270_s13, %s3070_s13   ;;  %s2174_s12 = sphi %s2268_s12, %s3068_s12   ;;  %s2170_s11 = sphi %s2266_s11, %s3084_s11   ;;  %s2166_s10 = sphi %s2264_s10, %s3083_s10   ;;  %s2162_s9 = sphi %s2262_s9, %s3082_s9   ;;  %s2158_s8 = sphi %s2260_s8, %s3065_s8   ;;  %s2154_s7 = sphi %s2258_s7, %s3081_s7   ;;  %s2150_s30 = sphi %s2256_s30, %s3063_s30   ;;  %s2146_s29 = sphi %s2254_s29, %s3080_s29   ;;  %s2142_s28 = sphi %s2252_s28, %s3079_s28   ;;  %s2138_s27 = sphi %s2250_s27, %s3078_s27   ;;  %s2134_s26 = sphi %s2248_s26, %s3077_s26   ;;  %s2130_s25 = sphi %s2246_s25, %s3075_s25   ;;  %s2126_s24 = sphi %s2244_s24, %s3059_s24   ;;  %s2122_s23 = sphi %s2242_s23, %s3073_s23   ;;  %s2118_s22 = sphi %s2240_s22, %s3071_s22   ;;  %s2114_s21 = sphi %s2238_s21, %s3069_s21  }
  0x1c   : > { %2981 = sst [smem:[#allocation21_spill]] %s2118_s22  ;;  %s1495_s18 = sadd.s32 4294967294, %s2190_s16  }
  0x1d   : > { %2982 = sst [smem:[#allocation22_spill]] %s2126_s24  ;;  %s41_s19 = sadd.s32 1, %s2182_s14 }
  0x1e   : > { %2983 = sst [smem:[#allocation23_spill]] %s2130_s25  ;;  %p48_p0 = scmp.lt.s32.totalorder %s2182_s14, 1 }
  0x1f   : > { %2984 = sst [smem:[#allocation24_spill]] %s2146_s29  ;;  %p2342_p1 = scmp.ge.s32.totalorder %s41_s19, 4 }
  0x20   : > { %2985 = sst [smem:[#allocation25_spill]] %s2154_s7  ;;  %p2944_p2 = scmp.eq.s32.totalorder %s2190_s16, 0 }
  0x21   : > { %2986 = sst [smem:[#allocation26_spill]] %s2158_s8  ;;  %s3087_s19 = smov (%p2342_p1, %s41_s19), 0 }
  0x22   : > { %2987 = sst [smem:[#allocation27_spill]] %s2170_s11  ;;  %p2943_p3 = scmp.eq.s32.totalorder %s2337_s17, 0 }
  0x23   : > { %2988 = sst [smem:[#allocation28_spill]] %s2174_s12  ;;  %s87_s6 = sadd.s32 1, %s2158_s8 }
  0x24   : > { %2989 = sst [smem:[#allocation29_spill]] %s2178_s13  ;;  %p50_p4 = scmp.lt.s32.totalorder %s3087_s19, 1 }
  0x25   : > { %2990 = sst [smem:[#allocation30_spill]] %s2182_s14  ;;  %p94_p5 = scmp.ne.s32.totalorder %s2158_s8, %s2154_s7 }
  0x26   : > { %2991 = sst [smem:[#allocation31_spill]] %s2186_s15  ;;  %p100_p6 = scmp.ne.s32.totalorder %s2154_s7, %s2150_s30 }
  0x27   : > { %s2348_s5 = scalar_select %p48_p0, %s2182_s14, 1 }
  0x28   : > { %2993 = sst [smem:[#allocation32_spill]] %s3087_s19  ;;  %s2945_s13 = sadd.s32 4294967294, %s3087_s19 }
  0x29   : > { %s51_s2 = scalar_select %p50_p4, %s3087_s19, 1 }
  0x2a   : > { %p2364_p7 = por %p94_p5, %p2944_p2  ;;  %p2370_p8 = por %p100_p6, %p2943_p3 }
  0x2b   : > { %s2375_s3 = ssub.s32 %s2348_s5, %s51_s2  ;;  %p2379_p9 = scmp.gt.s32.totalorder %s2945_s13, 0 }
  0x2c   : > { %s2995_s4 = scalar_select %p2370_p8, 1, 0 }
  0x2d   : > { %p85_p10 = scmp.eq.s32.totalorder %s2375_s3, 0  ;;  %p216_p11 = scmp.ne.s32.totalorder %s2134_s26, %s2130_s25 }
  0x2e   : > { %2996 = sst [smem:[#allocation33_spill]] %s2995_s4  ;;  %p217_p12 = scmp.eq.s32.totalorder %s2337_s17, 15 }
  0x2f   : > { %p222_p13 = scmp.ne.s32.totalorder %s2130_s25, %s2126_s24  ;;  %p223_p4 = scmp.eq.s32.totalorder %s1495_s18, 15 }
  0x30   : > { %s2390_s7 = scalar_select %p85_p10, %s2158_s8, %s87_s6  }
  0x31   : > { %p2392_p0 = por %p217_p12, %p216_p11  ;;  %p242_p5 = scmp.ne.s32.totalorder %s2122_s23, %s2118_s22 }
  0x32   : > { %2998 = sst [smem:[#allocation34_spill]] %s2390_s7  ;;  %p248_p6 = scmp.ne.s32.totalorder %s2118_s22, %s2114_s21 }
  0x33   : > { %s2999_s0 = scalar_select %p2392_p0, 1, 0 }
  0x34   : > { %p2400_p3 = por %p223_p4, %p222_p13  ;;  %p2404_p2 = por %p242_p5, %p217_p12 }
  0x35   : > { %3000 = sst [smem:[#allocation35_spill]] %s2999_s0  ;;  %p2408_p10 = por %p248_p6, %p223_p4 }
  0x36   : > { %s3001_s2 = scalar_select %p2400_p3, 1, 0 }
  0x37   : > { %s3003_s13 = scalar_select %p2404_p2, 1, 0 }
  0x38   : > { %3002 = sst [smem:[#allocation36_spill]] %s3001_s2  ;;  %p2959_p11 = scmp.lt.s32.totalorder %s2190_s16, 16 }
  0x39   : > { %3004 = sst [smem:[#allocation37_spill]] %s3003_s13  ;;  %s299_s18 = sand.u32 1, %s2190_s16  }
  0x3a   : > { %s3005_s6 = scalar_select %p2408_p10, 1, 0 }
  0x3b   : > { %s301_s7 = sand.u32 1, %s2158_s8   ;;  %s1542_s21 = sshll.u32 %s2348_s5, 9 }
  0x3c   : > { %3006 = sst [smem:[#allocation38_spill]] %s3005_s6  ;;  %s1509_s24 = sshll.u32 %s301_s7, 9 }
  0x3d   : > { %s3007_s1 = sld [smem:[#allocation45_spill]]  ;;  %s303_s13 = scalar_lea.vmem [#allocation6], %s1509_s24 }
  0x3e   : > { %s313_s4 = sshll.u32 %s303_s13, 4  ;;  %p1562_p12 = pnand %p2959_p11, %p2364_p7  ;;  %s314_s4 = int_to_ptr.vmem [resolvable:$true] %s313_s4 }
  0x3f   : > { %p1519_p13 = scmp.ge.s32.totalorder %s2190_s16, 1  ;;  %p368_p4 = scmp.lt.s32.totalorder %s2190_s16, 17 }
  0x40   : > { %s2425_s0 = scalar_lea.sflag [#allocation7], %s299_s18  ;;  %s2193_s22 = smov 8  }
  0x41   : > { %p2428_p5 = pnand %p1519_p13, %p368_p4  ;;  %s44_s7 = sadd.s32 1, %s2186_s15 }
  0x42   : > { %s3089_s7 = smov (!%p2342_p1, %s44_s7), %s2186_s15  ;;  %s57_s12 = sadd.s32 1, %s2170_s11 }
  0x43   : > { %s310_s2 = scalar_lea.hbm %s3007_s1, %s1542_s21  ;;  %s2192_s21 = smov 128  }
  0x44   : > { %s311_s25 = sshll.u32 %s310_s2, 4  ;;  %p64_p7 = scmp.ne.s32.totalorder %s2170_s11, %s2166_s10  ;;  %s312_s25 = int_to_ptr.hbm [resolvable:$true] %s311_s25 }
  0x45   : > { %1564 = dma.hbm_to_vmem [thread:$0]  (!%p1562_p12), %s312_s25, 8192, %s314_s4, %s2425_s0, %s2192_s21, %s2192_s21, %s2193_s22  }
  0x46   : > { %p46_p6 = scmp.ge.s32.totalorder %s3089_s7, 4  ;;  %p70_p11 = scmp.ne.s32.totalorder %s2166_s10, %s2162_s9 }
  0x47   : > { %p3009_p10 = scmp.eq.s32.totalorder %s2190_s16, 0  ;;  %s232_s4 = sadd.s32 1, %s2122_s23 }
  0x48   : > { %s3091_s7 = smov (%p46_p6, %s3089_s7), 0  ;;  %p3012_p12 = scmp.eq.s32.totalorder %s2337_s17, 0 }
  0x49   : > { %p2443_p3 = por %p3009_p10, %p64_p7  ;;  %3011 = sst [smem:[#allocation39_spill]] %s3091_s7 }
  0x4a   : > { %p2452_p13 = por %p3012_p12, %p70_p11  ;;  %s272_s20 = sand.u32 1, %s2170_s11  }
  0x4b   : > { %s2459_s2 = ssub.s32 %s2186_s15, %s3091_s7  ;;  %s1504_s18 = sshll.u32 %s272_s20, 8 }
  0x4c   : > { %s3013_s25 = scalar_select %p2452_p13, 1, 0 }
  0x4d   : > { %s54_s9 = sor.u32 %s2375_s3, %s2459_s2  ;;  %p230_p1 = scmp.eq.s32.totalorder %s2459_s2, 0 }
  0x4e   : > { %3014 = sst [smem:[#allocation40_spill]] %s3013_s25  ;;  %p55_p10 = scmp.eq.s32.totalorder %s54_s9, 0 }
  0x4f   : > { %s2465_s21 = scalar_select %p230_p1, %s2122_s23, %s232_s4  }
  0x50   : > { %s2468_s22 = scalar_select %p55_p10, %s2170_s11, %s57_s12  }
  0x51   : > { %s1506_s1 = sshll.u32 %s2348_s5, 2  ;;  %s1541_s8 = sshll.u32 %s2186_s15, 6 }
  0x52   : > { %3015 = sst [smem:[#allocation41_spill]] %s2468_s22  ;;  %s276_s6 = scalar_lea.vmem [#allocation3], %s1504_s18 }
  0x53   : > { %s289_s25 = sshll.u32 %s276_s6, 4  ;;  %s284_s7 = sadd.s32 %s1541_s8, %s1506_s1  ;;  %s290_s25 = int_to_ptr.vmem [resolvable:$true] %s289_s25 }
  0x54   : > { %s1508_s3 = sshll.u32 %s284_s7, 3  ;;  %p3016_p11 = scmp.lt.s32.totalorder %s2190_s16, 16 }
  0x55   : > { %s3017_s5 = sld [smem:[#allocation44_spill]]  ;;  %s273_s6 = scalar_lea.sflag [#allocation4], %s272_s20 }
  0x56   : > { %p1559_p4 = pnand %p3016_p11, %p2443_p3  ;;  %s2965_s1 = smov 1024  }
  0x57   : > { %s2966_s8 = smov 512   ;;  %s2967_s7 = smov 32  }
  0x58   : > { %s1496_s13 = sadd.s32 4294967294, %s2182_s14  ;;  %s140_s12 = sadd.s32 1, %s2146_s29 }
  0x59   : > { %p132_p3 = scmp.gt.s32.totalorder %s1496_s13, 0  ;;  %p147_p7 = scmp.ne.s32.totalorder %s2146_s29, %s2142_s28 }
  0x5a   : > { %p153_p6 = scmp.ne.s32.totalorder %s2142_s28, %s2138_s27  ;;  %s206_s4 = sadd.s32 1, %s2134_s26 }
  0x5b   : > { %s286_s9 = scalar_lea.hbm %s3017_s5, %s1508_s3  ;;  %s3018_s3 = sadd.s32 4294967294, %s3087_s19 }
  0x5c   : > { %s287_s18 = sshll.u32 %s286_s9, 4  ;;  %s3093_s3 = smov (!%p2379_p9, %s3018_s3), 0  ;;  %s288_s18 = int_to_ptr.hbm [resolvable:$true] %s287_s18 }
  0x5d   : > { %1561 = dma.hbm_to_vmem [thread:$0]  (!%p1559_p4), %s288_s18, 4096, %s290_s25, %s273_s6, %s2965_s1, %s2966_s8, %s2967_s7  }
  0x5e   : > { %s3095_s13 = smov (!%p132_p3, %s1496_s13), 0  ;;  %p3019_p1 = scmp.eq.s32.totalorder %s2190_s16, 0 }
  0x5f   : > { %s137_s20 = ssub.s32 %s3095_s13, %s3093_s3  ;;  %p3021_p11 = scmp.eq.s32.totalorder %s2337_s17, 0 }
  0x60   : > { %p138_p12 = scmp.eq.s32.totalorder %s137_s20, 0  ;;  %p2498_p10 = por %p147_p7, %p3019_p1 }
  0x61   : > { %p2504_p4 = por %p153_p6, %p3021_p11  ;;  %s203_s5 = sor.u32 %s137_s20, %s2459_s2 }
  0x62   : > { %s2510_s9 = scalar_select %p138_p12, %s2146_s29, %s140_s12  }
  0x63   : > { %p204_p9 = scmp.eq.s32.totalorder %s203_s5, 0  ;;  %s325_s27 = sand.u32 1, %s2146_s29  }
  0x64   : > { %3023 = sst [smem:[#allocation42_spill]] %s2510_s9  ;;  %s1512_s18 = sshll.u32 %s325_s27, 9 }
  0x65   : > { %s1543_s6 = sshll.u32 %s3095_s13, 5  ;;  %s3025_s7 = sld [smem:[#allocation47_spill]] }
  0x66   : > { %s2515_s3 = scalar_select %p204_p9, %s2134_s26, %s206_s4  }
  0x67   : > { %s327_s14 = scalar_lea.vmem [#allocation8], %s1512_s18  ;;  %p3026_p3 = scmp.lt.s32.totalorder %s2190_s16, 16 }
  0x68   : > { %3024 = sst [smem:[#allocation43_spill]] %s2515_s3  ;;  %s338_s22 = sshll.u32 %s327_s14, 4  ;;  %s339_s22 = int_to_ptr.vmem [resolvable:$true] %s338_s22 }
  0x69   : > { %p1565_p7 = pnand %p3026_p3, %p2498_p10  ;;  %s1516_s2 = sshll.u32 %s325_s27, 2 }
  0x6a   : > { %s1518_s12 = sshll.u32 %s3095_s13, 2  ;;  %s3027_s20 = smov 32  }
  0x6b   : > { %s335_s19 = scalar_lea.hbm %s3025_s7, %s1543_s6  ;;  %s3028_s5 = smov 512  }
  0x6c   : > { %s336_s15 = sshll.u32 %s335_s19, 4  ;;  %s3029_s11 = smov 1024   ;;  %s337_s15 = int_to_ptr.hbm [resolvable:$true] %s336_s15 }
  0x6d   : > { %1567 = dma.hbm_to_vmem [thread:$0]  (!%p1565_p7), %s337_s15, 8192, %s339_s22, %s2425_s0, %s3029_s11, %s3028_s5, %s3027_s20  }
  0x6e   : > { %s3030_s29 = sld [smem:[#allocation48_spill]]  ;;  %s352_s1 = scalar_lea.vmem [#allocation9], %s1516_s2 }
  0x6f   : > { %s363_s8 = sshll.u32 %s352_s1, 4  ;;  %s349_s14 = scalar_lea.sflag [#allocation10], %s325_s27  ;;  %s364_s8 = int_to_ptr.vmem [resolvable:$true] %s363_s8 }
  0x70   : > { %s374_s13 = sand.u32 (!%p2428_p5), 1, %s2166_s10  }
  0x71   : > { %s1520_s25 = sshll.u32 (!%p2428_p5), %s374_s13, 8  ;;  %s375_s18 = scalar_lea.sflag (!%p2428_p5), [#allocation4], %s374_s13 }
  0x72   : > { %372 = sbr.rel (%p2428_p5) target bundleno = 721 (0x2d1), region = 40  ;;  %s2535_s11 = scalar_lea.vmem (!%p2428_p5), [#allocation3], %s1520_s25 }
  0x74   : > { %s359_s3 = scalar_lea.hbm %s3030_s29, %s1518_s12 }
  0x75   : > { %s361_s19 = sshll.u32 %s359_s3, 4  ;;  %s362_s19 = int_to_ptr.hbm [resolvable:$true] %s361_s19 }
  0x76   : > { %1570 = dma.hbm_to_vmem [thread:$0]  (!%p1565_p7), %s362_s19, 64, %s364_s8, %s349_s14  }
  0x77   : > { %2089 = dma.done.wait (%p2452_p13), %s375_s18, 4096  }
  0x78   : > { %2091 = vsyncadd (%p2452_p13), %s375_s18, 4294963200  ;;  %s3032_s29 = sld [smem:[#allocation25_spill]]  ;;  %s384_s0 = sand.u32 1, %s2337_s17  }
  0x79   : > { %s385_s24 = scalar_lea.sflag [#allocation7], %s384_s0 }
  0x7e   : > { %s386_s22 = sand.u32 1, %s3032_s29  }
  0x7f   : > { %s1521_s9 = sshll.u32 %s386_s22, 9 }
  0x80   : > { %s2543_s27 = scalar_lea.vmem [#allocation6], %s1521_s9 }
  0x81   : > { %2093 = dma.done.wait (%p2370_p8), %s385_s24, 8192  }
  0x82   : > { %2095 = vsyncadd (%p2370_p8), %s385_s24, 4294959104  ;;  %s396_s6 = sand.u32 1, %s2142_s28  }
  0x83   : > { %s1522_s3 = sshll.u32 %s396_s6, 9 }
  0x84   : > { %s2550_s2 = scalar_lea.vmem [#allocation8], %s1522_s3 }
  0x85   : > { %2097 = dma.done.wait (%p2504_p4), %s385_s24, 8192  }
  0x86   : > { %2099 = vsyncadd (%p2504_p4), %s385_s24, 4294959104  ;;  %s1523_s17 = sshll.u32 %s396_s6, 2  ;;  %s405_s12 = scalar_lea.sflag [#allocation10], %s396_s6 }
  0x87   : > { %s2556_s20 = scalar_lea.vmem [#allocation9], %s1523_s17 }
  0x88   : > { %2101 = dma.done.wait (%p2504_p4), %s405_s12, 64  }
  0x89   : > { %2103 = vsyncadd (%p2504_p4), %s405_s12, 4294967232  ;;  %s3034_s5 = sld [smem:[#allocation23_spill]] }
  0x8a   : > { %s3035_s4 = sld [smem:[#allocation21_spill]] }
  0x8b   : > { %s3036_s25 = sld [smem:[#allocation28_spill]] }
  0x8f   : > { %s448_s1 = sand.u32 1, %s3034_s5  }
  0x90   : > { %s455_s8 = sand.u32 1, %s3035_s4   ;;  %s1524_s19 = sshll.u32 %s448_s1, 8 }
  0x91   : > { %s1525_s14 = sshll.u32 %s455_s8, 6  ;;  %s2568_s7 = scalar_lea.vmem [#allocation11], %s1524_s19 }
  0x92   : > { %s2570_s13 = scalar_lea.vmem [#allocation12], %s1525_s14  ;;  %p1526_p8 = scmp.ge.s32.totalorder %s3036_s25, 2 }
  0x93   : > { %s3037_s18 = sld [smem:[#allocation28_spill]] (!%p1526_p8) }
  0x94   : > { %482 = sbr.rel (%p1526_p8) target bundleno = 429 (0x1ad), region = 60 }
  0x99   : > { %p1527_p5 = scmp.ne.s32.totalorder %s3037_s18, 0 }
  0x9b   : > { %486 = sbr.rel (%p1527_p5) target bundleno = 169 (0xa9), region = 64 }
  0xa0   : > { %v2197_v0 = vmov 0.0  }
  0xa1   : > { %487 = vst [vmem:[#allocation2 + $0x30] sm:$0xff] %v2197_v0 }
  0xa2   : > { %488 = vst [vmem:[#allocation2] sm:$0xff] %v2197_v0 }
  0xa3   : > { %489 = vst [vmem:[#allocation2 + $0x18] sm:$0xff] %v2197_v0 }
  0xa4   : > { %490 = vst [vmem:[#allocation2 + $0x10] sm:$0xff] %v2197_v0 }
  0xa5   : > { %491 = vst [vmem:[#allocation2 + $0x8] sm:$0xff] %v2197_v0 }
  0xa6   : > { %492 = vst [vmem:[#allocation2 + $0x20] sm:$0xff] %v2197_v0 }
  0xa7   : > { %493 = vst [vmem:[#allocation2 + $0x28] sm:$0xff] %v2197_v0 }
  0xa8   : > { %494 = vst [vmem:[#allocation2 + $0x38] sm:$0xff] %v2197_v0 }
  0xa9 PF: > { %v582_v1 = vld [vmem:[%s2543_s27 + $0x178] sm:$0xff]  ;;  %v581_v2 = vld [vmem:[%s2543_s27 + $0x170] sm:$0xff]  ;;  %v580_v6 = vld [vmem:[%s2543_s27 + $0x168] sm:$0xff]  ;;  %s3038_s30 = sld [smem:[#allocation28_spill]] }
  0xaa   : > { %v598_v3 = vld [vmem:[%s2543_s27 + $0x1f8] sm:$0xff]  ;;  %681 = vmatpush.msra.mxu2 %v582_v1  ;;  %v597_v7 = vld [vmem:[%s2543_s27 + $0x1f0] sm:$0xff]  ;;  %v596_v10 = vld [vmem:[%s2543_s27 + $0x1e8] sm:$0xff] }
  0xab   : > { %722 = vmatpush.msra.mxu3 %v598_v3  ;;  %v550_v4 = vld [vmem:[%s2543_s27 + $0x78] sm:$0xff]  ;;  %v549_v8 = vld [vmem:[%s2543_s27 + $0x70] sm:$0xff]  ;;  %v548_v11 = vld [vmem:[%s2543_s27 + $0x68] sm:$0xff] }
  0xac   : > { %v566_v5 = vld [vmem:[%s2543_s27 + $0xf8] sm:$0xff]  ;;  %599 = vmatpush.msra.mxu0 %v550_v4  ;;  %v565_v9 = vld [vmem:[%s2543_s27 + $0xf0] sm:$0xff]  ;;  %682 = vmatpush.msra.mxu2 %v581_v2  ;;  %v579_v12 = vld [vmem:[%s2543_s27 + $0x160] sm:$0xff] }
  0xad   : > { %640 = vmatpush.msra.mxu1 %v566_v5  ;;  %723 = vmatpush.msra.mxu3 %v597_v7  ;;  %v564_v13 = vld [vmem:[%s2543_s27 + $0xe8] sm:$0xff]  ;;  %v595_v14 = vld [vmem:[%s2543_s27 + $0x1e0] sm:$0xff]  ;;  %v578_v17 = vld [vmem:[%s2543_s27 + $0x158] sm:$0xff] }
  0xae   : > { %600 = vmatpush.msra.mxu0 %v549_v8  ;;  %683 = vmatpush.msra.mxu2 %v580_v6  ;;  %v547_v15 = vld [vmem:[%s2543_s27 + $0x60] sm:$0xff]  ;;  %v594_v18 = vld [vmem:[%s2543_s27 + $0x1d8] sm:$0xff]  ;;  %v577_v21 = vld [vmem:[%s2543_s27 + $0x150] sm:$0xff] }
  0xaf   : > { %641 = vmatpush.msra.mxu1 %v565_v9  ;;  %724 = vmatpush.msra.mxu3 %v596_v10  ;;  %v563_v16 = vld [vmem:[%s2543_s27 + $0xe0] sm:$0xff]  ;;  %v546_v19 = vld [vmem:[%s2543_s27 + $0x58] sm:$0xff]  ;;  %v593_v22 = vld [vmem:[%s2543_s27 + $0x1d0] sm:$0xff]  ;;  %p1528_p13 = scmp.ne.s32.totalorder %s3038_s30, 1 }
  0xb0   : > { %601 = vmatpush.msra.mxu0 %v548_v11  ;;  %684 = vmatpush.msra.mxu2 %v579_v12  ;;  %v562_v20 = vld [vmem:[%s2543_s27 + $0xd8] sm:$0xff]  ;;  %v545_v23 = vld [vmem:[%s2543_s27 + $0x50] sm:$0xff]  ;;  %v576_v25 = vld [vmem:[%s2543_s27 + $0x148] sm:$0xff]  ;;  %s3039_s15 = sld [smem:[#allocation46_spill]] (!%p1528_p13) }
  0xb1   : > { %642 = vmatpush.msra.mxu1 %v564_v13  ;;  %725 = vmatpush.msra.mxu3 %v595_v14  ;;  %v561_v24 = vld [vmem:[%s2543_s27 + $0xd0] sm:$0xff]  ;;  %v592_v26 = vld [vmem:[%s2543_s27 + $0x1c8] sm:$0xff]  ;;  %v575_v29 = vld [vmem:[%s2543_s27 + $0x140] sm:$0xff] }
  0xb2   : > { %602 = vmatpush.msra.mxu0 %v547_v15  ;;  %685 = vmatpush.msra.mxu2 %v578_v17  ;;  %v544_v27 = vld [vmem:[%s2543_s27 + $0x48] sm:$0xff]  ;;  %v591_v30 = vld [vmem:[%s2543_s27 + $0x1c0] sm:$0xff]  ;;  %v574_v33 = vld [vmem:[%s2543_s27 + $0x138] sm:$0xff] }
  0xb3   : > { %643 = vmatpush.msra.mxu1 %v563_v16  ;;  %726 = vmatpush.msra.mxu3 %v594_v18  ;;  %v560_v28 = vld [vmem:[%s2543_s27 + $0xc8] sm:$0xff]  ;;  %v543_v31 = vld [vmem:[%s2543_s27 + $0x40] sm:$0xff]  ;;  %v590_v34 = vld [vmem:[%s2543_s27 + $0x1b8] sm:$0xff] }
  0xb4   : > { %603 = vmatpush.msra.mxu0 %v546_v19  ;;  %686 = vmatpush.msra.mxu2 %v577_v21  ;;  %v559_v32 = vld [vmem:[%s2543_s27 + $0xc0] sm:$0xff]  ;;  %v542_v35 = vld [vmem:[%s2543_s27 + $0x38] sm:$0xff]  ;;  %v573_v37 = vld [vmem:[%s2543_s27 + $0x130] sm:$0xff] }
  0xb5   : > { %644 = vmatpush.msra.mxu1 %v562_v20  ;;  %727 = vmatpush.msra.mxu3 %v593_v22  ;;  %v558_v36 = vld [vmem:[%s2543_s27 + $0xb8] sm:$0xff]  ;;  %v589_v38 = vld [vmem:[%s2543_s27 + $0x1b0] sm:$0xff]  ;;  %v572_v41 = vld [vmem:[%s2543_s27 + $0x128] sm:$0xff] }
  0xb6   : > { %604 = vmatpush.msra.mxu0 %v545_v23  ;;  %687 = vmatpush.msra.mxu2 %v576_v25  ;;  %v541_v39 = vld [vmem:[%s2543_s27 + $0x30] sm:$0xff]  ;;  %v588_v42 = vld [vmem:[%s2543_s27 + $0x1a8] sm:$0xff]  ;;  %v571_v45 = vld [vmem:[%s2543_s27 + $0x120] sm:$0xff] }
  0xb7   : > { %645 = vmatpush.msra.mxu1 %v561_v24  ;;  %728 = vmatpush.msra.mxu3 %v592_v26  ;;  %v557_v40 = vld [vmem:[%s2543_s27 + $0xb0] sm:$0xff]  ;;  %v540_v43 = vld [vmem:[%s2543_s27 + $0x28] sm:$0xff]  ;;  %v587_v46 = vld [vmem:[%s2543_s27 + $0x1a0] sm:$0xff] }
  0xb8   : > { %605 = vmatpush.msra.mxu0 %v544_v27  ;;  %688 = vmatpush.msra.mxu2 %v575_v29  ;;  %v556_v44 = vld [vmem:[%s2543_s27 + $0xa8] sm:$0xff]  ;;  %v539_v47 = vld [vmem:[%s2543_s27 + $0x20] sm:$0xff]  ;;  %v570_v49 = vld [vmem:[%s2543_s27 + $0x118] sm:$0xff] }
  0xb9   : > { %646 = vmatpush.msra.mxu1 %v560_v28  ;;  %729 = vmatpush.msra.mxu3 %v591_v30  ;;  %v555_v48 = vld [vmem:[%s2543_s27 + $0xa0] sm:$0xff]  ;;  %v586_v50 = vld [vmem:[%s2543_s27 + $0x198] sm:$0xff]  ;;  %v569_v53 = vld [vmem:[%s2543_s27 + $0x110] sm:$0xff] }
  0xba   : > { %606 = vmatpush.msra.mxu0 %v543_v31  ;;  %689 = vmatpush.msra.mxu2 %v574_v33  ;;  %v538_v51 = vld [vmem:[%s2543_s27 + $0x18] sm:$0xff]  ;;  %v585_v54 = vld [vmem:[%s2543_s27 + $0x190] sm:$0xff]  ;;  %v568_v57 = vld [vmem:[%s2543_s27 + $0x108] sm:$0xff] }
  0xbb   : > { %647 = vmatpush.msra.mxu1 %v559_v32  ;;  %730 = vmatpush.msra.mxu3 %v590_v34  ;;  %v554_v52 = vld [vmem:[%s2543_s27 + $0x98] sm:$0xff]  ;;  %v537_v55 = vld [vmem:[%s2543_s27 + $0x10] sm:$0xff]  ;;  %v584_v58 = vld [vmem:[%s2543_s27 + $0x188] sm:$0xff] }
  0xbc   : > { %607 = vmatpush.msra.mxu0 %v542_v35  ;;  %690 = vmatpush.msra.mxu2 %v573_v37  ;;  %v553_v56 = vld [vmem:[%s2543_s27 + $0x90] sm:$0xff]  ;;  %v536_v59 = vld [vmem:[%s2543_s27 + $0x8] sm:$0xff]  ;;  %v567_v61 = vld [vmem:[%s2543_s27 + $0x100] sm:$0xff] }
  0xbd   : > { %648 = vmatpush.msra.mxu1 %v558_v36  ;;  %731 = vmatpush.msra.mxu3 %v589_v38  ;;  %v552_v60 = vld [vmem:[%s2543_s27 + $0x88] sm:$0xff]  ;;  %v583_v62 = vld [vmem:[%s2543_s27 + $0x180] sm:$0xff]  ;;  %v497_v63 = vld [vmem:[%s2535_s11 + $0x10] sm:$0xff] }
  0xbe   : > { %608 = vmatpush.msra.mxu0 %v541_v39  ;;  %691 = vmatpush.msra.mxu2 %v572_v41  ;;  %v498_v0 = vld [vmem:[%s2535_s11 + $0x18] sm:$0xff]  ;;  %v535_v1 = vld [vmem:[%s2543_s27] sm:$0xff]  ;;  %v496_v4 = vld [vmem:[%s2535_s11 + $0x8] sm:$0xff] }
  0xbf   : > { %649 = vmatpush.msra.mxu1 %v557_v40  ;;  %732 = vmatpush.msra.mxu3 %v588_v42  ;;  %v551_v2 = vld [vmem:[%s2543_s27 + $0x80] sm:$0xff]  ;;  %v501_v5 = vld [vmem:[%s2535_s11 + $0x30] sm:$0xff]  ;;  %v502_v6 = vld [vmem:[%s2535_s11 + $0x38] sm:$0xff] }
  0xc0   : > { %609 = vmatpush.msra.mxu0 %v540_v43  ;;  %692 = vmatpush.msra.mxu2 %v571_v45  ;;  %v495_v3 = vld [vmem:[%s2535_s11] sm:$0xff]  ;;  %v500_v8 = vld [vmem:[%s2535_s11 + $0x28] sm:$0xff]  ;;  %v505_v9 = vld [vmem:[%s2535_s11 + $0x50] sm:$0xff] }
  0xc1   : > { %650 = vmatpush.msra.mxu1 %v556_v44  ;;  %733 = vmatpush.msra.mxu3 %v587_v46  ;;  %v499_v7 = vld [vmem:[%s2535_s11 + $0x20] sm:$0xff]  ;;  %v506_v10 = vld [vmem:[%s2535_s11 + $0x58] sm:$0xff]  ;;  %v504_v12 = vld [vmem:[%s2535_s11 + $0x48] sm:$0xff] }
  0xc2   : > { %610 = vmatpush.msra.mxu0 %v539_v47  ;;  %693 = vmatpush.msra.mxu2 %v570_v49  ;;  %v503_v11 = vld [vmem:[%s2535_s11 + $0x40] sm:$0xff]  ;;  %v509_v13 = vld [vmem:[%s2535_s11 + $0x70] sm:$0xff]  ;;  %v510_v14 = vld [vmem:[%s2535_s11 + $0x78] sm:$0xff] }
  0xc3   : > { %651 = vmatpush.msra.mxu1 %v555_v48  ;;  %734 = vmatpush.msra.mxu3 %v586_v50  ;;  %v507_v15 = vld [vmem:[%s2535_s11 + $0x60] sm:$0xff]  ;;  %v508_v16 = vld [vmem:[%s2535_s11 + $0x68] sm:$0xff]  ;;  %v513_v17 = vld [vmem:[%s2535_s11 + $0x90] sm:$0xff] }
  0xc4   : > { %611 = vmatpush.msra.mxu0 %v538_v51  ;;  %694 = vmatpush.msra.mxu2 %v569_v53  ;;  %v514_v18 = vld [vmem:[%s2535_s11 + $0x98] sm:$0xff]  ;;  %v511_v19 = vld [vmem:[%s2535_s11 + $0x80] sm:$0xff]  ;;  %v512_v20 = vld [vmem:[%s2535_s11 + $0x88] sm:$0xff] }
  0xc5   : > { %652 = vmatpush.msra.mxu1 %v554_v52  ;;  %735 = vmatpush.msra.mxu3 %v585_v54  ;;  %v517_v21 = vld [vmem:[%s2535_s11 + $0xb0] sm:$0xff]  ;;  %v518_v22 = vld [vmem:[%s2535_s11 + $0xb8] sm:$0xff]  ;;  %v515_v23 = vld [vmem:[%s2535_s11 + $0xa0] sm:$0xff] }
  0xc6   : > { %612 = vmatpush.msra.mxu0 %v537_v55  ;;  %695 = vmatpush.msra.mxu2 %v568_v57  ;;  %v516_v24 = vld [vmem:[%s2535_s11 + $0xa8] sm:$0xff]  ;;  %v521_v25 = vld [vmem:[%s2535_s11 + $0xd0] sm:$0xff]  ;;  %v522_v26 = vld [vmem:[%s2535_s11 + $0xd8] sm:$0xff] }
  0xc7   : > { %653 = vmatpush.msra.mxu1 %v553_v56  ;;  %736 = vmatpush.msra.mxu3 %v584_v58  ;;  %v519_v27 = vld [vmem:[%s2535_s11 + $0xc0] sm:$0xff]  ;;  %v520_v28 = vld [vmem:[%s2535_s11 + $0xc8] sm:$0xff]  ;;  %v525_v29 = vld [vmem:[%s2535_s11 + $0xf0] sm:$0xff] }
  0xc8   : > { %613 = vmatpush.msra.mxu0 %v536_v59  ;;  %696 = vmatpush.msra.mxu2 %v567_v61  ;;  %v526_v30 = vld [vmem:[%s2535_s11 + $0xf8] sm:$0xff]  ;;  %v523_v31 = vld [vmem:[%s2535_s11 + $0xe0] sm:$0xff]  ;;  %v524_v32 = vld [vmem:[%s2535_s11 + $0xe8] sm:$0xff] }
  0xc9   : > { %654 = vmatpush.msra.mxu1 %v552_v60  ;;  %737 = vmatpush.msra.mxu3 %v583_v62  ;;  %v527_v39 = vld [vmem:[#allocation2 + $0x30] sm:$0xff]  ;;  %v528_v48 = vld [vmem:[#allocation2] sm:$0xff]  ;;  %v529_v57 = vld [vmem:[#allocation2 + $0x18] sm:$0xff] }
  0xca   : > { %697 = vmatmul.f32.vlgmr.msra.gmra.mxu2 %v497_v63  ;;  %738 = vmatmul.f32.vlgmr.msra.gmra.mxu3 %v498_v0 }
  0xcb   : > { %614 = vmatpush.msra.mxu0 %v535_v1  ;;  %655 = vmatpush.msra.mxu1 %v551_v2  ;;  %v530_v2 = vld [vmem:[#allocation2 + $0x10] sm:$0xff] }
  0xcc   : > { %615 = vmatmul.f32.vlgmr.msra.gmra.mxu0 %v495_v3  ;;  %656 = vmatmul.f32.vlgmr.msra.gmra.mxu1 %v496_v4 }
  0xd2   : > { %700 = vmatmul.f32.gmra.mxu2 %v501_v5  ;;  %741 = vmatmul.f32.gmra.mxu3 %v502_v6 }
  0xd4   : > { %618 = vmatmul.f32.gmra.mxu0 %v499_v7  ;;  %659 = vmatmul.f32.gmra.mxu1 %v500_v8 }
  0xda   : > { %703 = vmatmul.f32.gmra.mxu2 %v505_v9  ;;  %744 = vmatmul.f32.gmra.mxu3 %v506_v10 }
  0xdc   : > { %621 = vmatmul.f32.gmra.mxu0 %v503_v11  ;;  %662 = vmatmul.f32.gmra.mxu1 %v504_v12  ;;  %v531_v11 = vld [vmem:[#allocation2 + $0x8] sm:$0xff] }
  0xe2   : > { %706 = vmatmul.f32.gmra.mxu2 %v509_v13  ;;  %747 = vmatmul.f32.gmra.mxu3 %v510_v14 }
  0xe4   : > { %624 = vmatmul.f32.gmra.mxu0 %v507_v15  ;;  %665 = vmatmul.f32.gmra.mxu1 %v508_v16 }
  0xea   : > { %709 = vmatmul.f32.gmra.mxu2 %v513_v17  ;;  %750 = vmatmul.f32.gmra.mxu3 %v514_v18 }
  0xec   : > { %627 = vmatmul.f32.gmra.mxu0 %v511_v19  ;;  %668 = vmatmul.f32.gmra.mxu1 %v512_v20  ;;  %v532_v20 = vld [vmem:[#allocation2 + $0x20] sm:$0xff] }
  0xf2   : > { %712 = vmatmul.f32.gmra.mxu2 %v517_v21  ;;  %753 = vmatmul.f32.gmra.mxu3 %v518_v22 }
  0xf4   : > { %630 = vmatmul.f32.gmra.mxu0 %v515_v23  ;;  %671 = vmatmul.f32.gmra.mxu1 %v516_v24 }
  0xfa   : > { %715 = vmatmul.f32.gmra.mxu2 %v521_v25  ;;  %756 = vmatmul.f32.gmra.mxu3 %v522_v26 }
  0xfc   : > { %633 = vmatmul.f32.gmra.mxu0 %v519_v27  ;;  %674 = vmatmul.f32.gmra.mxu1 %v520_v28 }
 0x102   : > { %718 = vmatmul.f32.gmra.mxu2 %v525_v29  ;;  %759 = vmatmul.f32.gmra.mxu3 %v526_v30  ;;  %v533_v29 = vld [vmem:[#allocation2 + $0x28] sm:$0xff] }
 0x104   : > { %636 = vmatmul.f32.gmra.mxu0 %v523_v31  ;;  %677 = vmatmul.f32.gmra.mxu1 %v524_v32 }
 0x149   : > { %v616_v33 = vpop.f32.mrf.mxu0  ;;  %v657_v34 = vpop.f32.mrf.mxu1 }
 0x14a   : > { %v658_v35 = vadd.f32 %v657_v34, %v616_v33 }
 0x14d   : > { %v698_v36 = vpop.f32.mrf.mxu2  ;;  %v739_v37 = vpop.f32.mrf.mxu3 }
 0x14e   : > { %v699_v38 = vadd.f32 %v698_v36, %v658_v35 }
 0x150   : > { %v740_v40 = vadd.f32 %v739_v37, %v699_v38  ;;  %v534_v38 = vld [vmem:[#allocation2 + $0x38] sm:$0xff] }
 0x151   : > { %v619_v41 = vpop.f32.mrf.mxu0  ;;  %v660_v42 = vpop.f32.mrf.mxu1 }
 0x152   : > { %v763_v43 = vadd.f32 %v740_v40, %v527_v39  ;;  %v661_v44 = vadd.f32 %v660_v42, %v619_v41 }
 0x154   : > { %771 = vst [vmem:[#allocation2 + $0x30] sm:$0xff] %v763_v43 }
 0x155   : > { %v701_v45 = vpop.f32.mrf.mxu2  ;;  %v742_v46 = vpop.f32.mrf.mxu3 }
 0x156   : > { %v702_v47 = vadd.f32 %v701_v45, %v661_v44 }
 0x158   : > { %v743_v49 = vadd.f32 %v742_v46, %v702_v47 }
 0x159   : > { %v622_v50 = vpop.f32.mrf.mxu0  ;;  %v663_v51 = vpop.f32.mrf.mxu1 }
 0x15a   : > { %v764_v52 = vadd.f32 %v743_v49, %v528_v48  ;;  %v664_v53 = vadd.f32 %v663_v51, %v622_v50 }
 0x15c   : > { %772 = vst [vmem:[#allocation2] sm:$0xff] %v764_v52 }
 0x15d   : > { %v704_v54 = vpop.f32.mrf.mxu2  ;;  %v745_v55 = vpop.f32.mrf.mxu3 }
 0x15e   : > { %v705_v56 = vadd.f32 %v704_v54, %v664_v53 }
 0x160   : > { %v746_v58 = vadd.f32 %v745_v55, %v705_v56 }
 0x161   : > { %v625_v59 = vpop.f32.mrf.mxu0  ;;  %v666_v60 = vpop.f32.mrf.mxu1 }
 0x162   : > { %v765_v61 = vadd.f32 %v746_v58, %v529_v57  ;;  %v667_v62 = vadd.f32 %v666_v60, %v625_v59 }
 0x164   : > { %773 = vst [vmem:[#allocation2 + $0x18] sm:$0xff] %v765_v61 }
 0x165   : > { %v707_v63 = vpop.f32.mrf.mxu2  ;;  %v748_v0 = vpop.f32.mrf.mxu3 }
 0x166   : > { %v708_v1 = vadd.f32 %v707_v63, %v667_v62 }
 0x168   : > { %v749_v3 = vadd.f32 %v748_v0, %v708_v1 }
 0x169   : > { %v628_v4 = vpop.f32.mrf.mxu0  ;;  %v669_v5 = vpop.f32.mrf.mxu1 }
 0x16a   : > { %v766_v6 = vadd.f32 %v749_v3, %v530_v2  ;;  %v670_v7 = vadd.f32 %v669_v5, %v628_v4 }
 0x16c   : > { %774 = vst [vmem:[#allocation2 + $0x10] sm:$0xff] %v766_v6 }
 0x16d   : > { %v710_v8 = vpop.f32.mrf.mxu2  ;;  %v751_v9 = vpop.f32.mrf.mxu3 }
 0x16e   : > { %v711_v10 = vadd.f32 %v710_v8, %v670_v7 }
 0x170   : > { %v752_v12 = vadd.f32 %v751_v9, %v711_v10 }
 0x171   : > { %v631_v13 = vpop.f32.mrf.mxu0  ;;  %v672_v14 = vpop.f32.mrf.mxu1 }
 0x172   : > { %v767_v15 = vadd.f32 %v752_v12, %v531_v11  ;;  %v673_v16 = vadd.f32 %v672_v14, %v631_v13 }
 0x174   : > { %775 = vst [vmem:[#allocation2 + $0x8] sm:$0xff] %v767_v15 }
 0x175   : > { %v713_v17 = vpop.f32.mrf.mxu2  ;;  %v754_v18 = vpop.f32.mrf.mxu3 }
 0x176   : > { %v714_v19 = vadd.f32 %v713_v17, %v673_v16 }
 0x178   : > { %v755_v21 = vadd.f32 %v754_v18, %v714_v19 }
 0x179   : > { %v634_v22 = vpop.f32.mrf.mxu0  ;;  %v675_v23 = vpop.f32.mrf.mxu1 }
 0x17a   : > { %v768_v24 = vadd.f32 %v755_v21, %v532_v20  ;;  %v676_v25 = vadd.f32 %v675_v23, %v634_v22 }
 0x17c   : > { %776 = vst [vmem:[#allocation2 + $0x20] sm:$0xff] %v768_v24 }
 0x17d   : > { %v716_v26 = vpop.f32.mrf.mxu2  ;;  %v757_v27 = vpop.f32.mrf.mxu3 }
 0x17e   : > { %v717_v28 = vadd.f32 %v716_v26, %v676_v25 }
 0x180   : > { %v758_v30 = vadd.f32 %v757_v27, %v717_v28 }
 0x181   : > { %v637_v31 = vpop.f32.mrf.mxu0  ;;  %v678_v32 = vpop.f32.mrf.mxu1 }
 0x182   : > { %v769_v33 = vadd.f32 %v758_v30, %v533_v29  ;;  %v679_v34 = vadd.f32 %v678_v32, %v637_v31 }
 0x184   : > { %777 = vst [vmem:[#allocation2 + $0x28] sm:$0xff] %v769_v33 }
 0x185   : > { %v719_v35 = vpop.f32.mrf.mxu2  ;;  %v760_v36 = vpop.f32.mrf.mxu3 }
 0x186   : > { %v720_v37 = vadd.f32 %v719_v35, %v679_v34 }
 0x188   : > { %v761_v39 = vadd.f32 %v760_v36, %v720_v37  ;;  %782 = sbr.rel (%p1528_p13) target bundleno = 429 (0x1ad), region = 68 }
 0x18a   : > { %v770_v40 = vadd.f32 %v761_v39, %v534_v38 }
 0x18c   : > { %778 = vst [vmem:[#allocation2 + $0x38] sm:$0xff] %v770_v40 }
 0x18d   : > { %v783_v41 = vld [vmem:[#allocation2 + $0x30] sm:$0xff]  ;;  %v1751_v42 = vld [vmem:[%s3039_s15] ss:$0 sm:$0xff]  ;;  %v785_v44 = vld [vmem:[#allocation2 + $0x18] sm:$0xff] }
 0x18e   : > { %v784_v43 = vld [vmem:[#allocation2] sm:$0xff]  ;;  %v786_v45 = vld [vmem:[#allocation2 + $0x10] sm:$0xff]  ;;  %v795_v46 = vadd.f32 %v1751_v42, %v783_v41  ;;  %v797_v48 = vadd.f32 %v1751_v42, %v785_v44  ;;  %v787_v50 = vld [vmem:[#allocation2 + $0x8] sm:$0xff] }
 0x18f   : > { %v796_v47 = vadd.f32 %v1751_v42, %v784_v43  ;;  %v798_v49 = vadd.f32 %v1751_v42, %v786_v45  ;;  %v788_v51 = vld [vmem:[#allocation2 + $0x20] sm:$0xff]  ;;  %v789_v52 = vld [vmem:[#allocation2 + $0x28] sm:$0xff]  ;;  %v799_v53 = vadd.f32 %v1751_v42, %v787_v50 }
 0x190   : > { %v800_v54 = vadd.f32 %v1751_v42, %v788_v51  ;;  %v803_v56 = vmul.f32 0.5, %v795_v46  ;;  %v805_v58 = vmul.f32 0.5, %v797_v48  ;;  %v801_v59 = vadd.f32 %v1751_v42, %v789_v52 }
 0x191   : > { %v804_v57 = vmul.f32 0.5, %v796_v47  ;;  %v806_v60 = vmul.f32 0.5, %v798_v49  ;;  %v807_v61 = vmul.f32 0.5, %v799_v53 }
 0x192   : > { %1752 = vtanh.f32 %v803_v56  ;;  %v808_v63 = vmul.f32 0.5, %v800_v54  ;;  %v809_v0 = vmul.f32 0.5, %v801_v59 }
 0x193   : > { %v790_v55 = vld [vmem:[#allocation2 + $0x38] sm:$0xff]  ;;  %1754 = vtanh.f32 %v804_v57 }
 0x194   : > { %v802_v62 = vadd.f32 %v1751_v42, %v790_v55  ;;  %1756 = vtanh.f32 %v805_v58 }
 0x195   : > { %1758 = vtanh.f32 %v806_v60 }
 0x196   : > { %1760 = vtanh.f32 %v807_v61  ;;  %v810_v1 = vmul.f32 0.5, %v802_v62 }
 0x197   : > { %1762 = vtanh.f32 %v808_v63 }
 0x198   : > { %v1753_v2 = vpop.eup %1752  ;;  %1764 = vtanh.f32 %v809_v0 }
 0x199   : > { %v1755_v3 = vpop.eup %1754  ;;  %v819_v4 = vadd.f32 1.0, %v1753_v2  ;;  %1766 = vtanh.f32 %v810_v1 }
 0x19a   : > { %v1757_v5 = vpop.eup %1756  ;;  %v820_v6 = vadd.f32 1.0, %v1755_v3 }
 0x19b   : > { %v1759_v7 = vpop.eup %1758  ;;  %v827_v8 = vmul.f32 0.5, %v819_v4  ;;  %v821_v9 = vadd.f32 1.0, %v1757_v5 }
 0x19c   : > { %v1761_v10 = vpop.eup %1760  ;;  %v828_v11 = vmul.f32 0.5, %v820_v6  ;;  %v822_v12 = vadd.f32 1.0, %v1759_v7 }
 0x19d   : > { %v1763_v13 = vpop.eup %1762  ;;  %835 = vst [vmem:[#allocation2 + $0x30] sm:$0xff] %v827_v8  ;;  %v829_v14 = vmul.f32 0.5, %v821_v9  ;;  %v823_v15 = vadd.f32 1.0, %v1761_v10 }
 0x19e   : > { %v1765_v16 = vpop.eup %1764  ;;  %843 = vst [vmem:[%s2570_s13] sm:$0xff] %v827_v8  ;;  %v830_v17 = vmul.f32 0.5, %v822_v12  ;;  %v824_v18 = vadd.f32 1.0, %v1763_v13 }
 0x19f   : > { %836 = vst [vmem:[#allocation2] sm:$0xff] %v828_v11  ;;  %v1767_v19 = vpop.eup %1766  ;;  %v831_v20 = vmul.f32 0.5, %v823_v15  ;;  %v825_v21 = vadd.f32 1.0, %v1765_v16 }
 0x1a0   : > { %844 = vst [vmem:[%s2570_s13 + $0x8] sm:$0xff] %v828_v11  ;;  %v832_v22 = vmul.f32 0.5, %v824_v18  ;;  %v826_v23 = vadd.f32 1.0, %v1767_v19 }
 0x1a1   : > { %837 = vst [vmem:[#allocation2 + $0x18] sm:$0xff] %v829_v14  ;;  %v833_v24 = vmul.f32 0.5, %v825_v21 }
 0x1a2   : > { %845 = vst [vmem:[%s2570_s13 + $0x10] sm:$0xff] %v829_v14  ;;  %v834_v25 = vmul.f32 0.5, %v826_v23 }
 0x1a3   : > { %838 = vst [vmem:[#allocation2 + $0x10] sm:$0xff] %v830_v17 }
 0x1a4   : > { %846 = vst [vmem:[%s2570_s13 + $0x18] sm:$0xff] %v830_v17 }
 0x1a5   : > { %839 = vst [vmem:[#allocation2 + $0x8] sm:$0xff] %v831_v20 }
 0x1a6   : > { %847 = vst [vmem:[%s2570_s13 + $0x20] sm:$0xff] %v831_v20 }
 0x1a7   : > { %840 = vst [vmem:[#allocation2 + $0x20] sm:$0xff] %v832_v22 }
 0x1a8   : > { %848 = vst [vmem:[%s2570_s13 + $0x28] sm:$0xff] %v832_v22 }
 0x1a9   : > { %841 = vst [vmem:[#allocation2 + $0x28] sm:$0xff] %v833_v24 }
 0x1aa   : > { %849 = vst [vmem:[%s2570_s13 + $0x30] sm:$0xff] %v833_v24 }
 0x1ab   : > { %842 = vst [vmem:[#allocation2 + $0x38] sm:$0xff] %v834_v25 }
 0x1ac   : > { %850 = vst [vmem:[%s2570_s13 + $0x38] sm:$0xff] %v834_v25 }
 0x1ad PF: > { %s3040_s0 = sld [smem:[#allocation28_spill]] }
 0x1b3   : > { %p1529_p6 = scmp.lt.s32.totalorder %s3040_s0, 2 }
 0x1b5   : > { %854 = sbr.rel (%p1529_p6) target bundleno = 679 (0x2a7), region = 72 }
 0x1ba   : > { %v925_v26 = vld [vmem:[%s2550_s2 + $0x1f0] sm:$0xff]  ;;  %v926_v27 = vld [vmem:[%s2550_s2 + $0x1f8] sm:$0xff]  ;;  %v923_v32 = vld [vmem:[%s2550_s2 + $0x1e0] sm:$0xff] }
 0x1bb   : > { %v921_v28 = vld [vmem:[%s2550_s2 + $0x1d0] sm:$0xff]  ;;  %1019 = vmatpush.msra.mxu2 %v925_v26  ;;  %1060 = vmatpush.msra.mxu3 %v926_v27  ;;  %v922_v29 = vld [vmem:[%s2550_s2 + $0x1d8] sm:$0xff]  ;;  %v924_v33 = vld [vmem:[%s2550_s2 + $0x1e8] sm:$0xff] }
 0x1bc   : > { %v917_v30 = vld [vmem:[%s2550_s2 + $0x1b0] sm:$0xff]  ;;  %v918_v31 = vld [vmem:[%s2550_s2 + $0x1b8] sm:$0xff]  ;;  %v919_v34 = vld [vmem:[%s2550_s2 + $0x1c0] sm:$0xff]  ;;  %937 = vmatpush.msra.mxu0 %v923_v32  ;;  %978 = vmatpush.msra.mxu1 %v924_v33 }
 0x1bd   : > { %1020 = vmatpush.msra.mxu2 %v921_v28  ;;  %1061 = vmatpush.msra.mxu3 %v922_v29  ;;  %v920_v35 = vld [vmem:[%s2550_s2 + $0x1c8] sm:$0xff]  ;;  %v913_v36 = vld [vmem:[%s2550_s2 + $0x190] sm:$0xff]  ;;  %v914_v37 = vld [vmem:[%s2550_s2 + $0x198] sm:$0xff] }
 0x1be   : > { %v915_v38 = vld [vmem:[%s2550_s2 + $0x1a0] sm:$0xff]  ;;  %v916_v39 = vld [vmem:[%s2550_s2 + $0x1a8] sm:$0xff]  ;;  %938 = vmatpush.msra.mxu0 %v919_v34  ;;  %979 = vmatpush.msra.mxu1 %v920_v35  ;;  %v909_v40 = vld [vmem:[%s2550_s2 + $0x170] sm:$0xff] }
 0x1bf   : > { %1021 = vmatpush.msra.mxu2 %v917_v30  ;;  %1062 = vmatpush.msra.mxu3 %v918_v31  ;;  %v910_v41 = vld [vmem:[%s2550_s2 + $0x178] sm:$0xff]  ;;  %v911_v42 = vld [vmem:[%s2550_s2 + $0x180] sm:$0xff]  ;;  %v912_v43 = vld [vmem:[%s2550_s2 + $0x188] sm:$0xff] }
 0x1c0   : > { %939 = vmatpush.msra.mxu0 %v915_v38  ;;  %980 = vmatpush.msra.mxu1 %v916_v39  ;;  %v905_v44 = vld [vmem:[%s2550_s2 + $0x150] sm:$0xff]  ;;  %v906_v45 = vld [vmem:[%s2550_s2 + $0x158] sm:$0xff]  ;;  %v907_v46 = vld [vmem:[%s2550_s2 + $0x160] sm:$0xff] }
 0x1c1   : > { %1022 = vmatpush.msra.mxu2 %v913_v36  ;;  %1063 = vmatpush.msra.mxu3 %v914_v37  ;;  %v908_v47 = vld [vmem:[%s2550_s2 + $0x168] sm:$0xff]  ;;  %v901_v48 = vld [vmem:[%s2550_s2 + $0x130] sm:$0xff]  ;;  %v902_v49 = vld [vmem:[%s2550_s2 + $0x138] sm:$0xff] }
 0x1c2   : > { %940 = vmatpush.msra.mxu0 %v911_v42  ;;  %981 = vmatpush.msra.mxu1 %v912_v43  ;;  %v903_v50 = vld [vmem:[%s2550_s2 + $0x140] sm:$0xff]  ;;  %v904_v51 = vld [vmem:[%s2550_s2 + $0x148] sm:$0xff]  ;;  %v897_v52 = vld [vmem:[%s2550_s2 + $0x110] sm:$0xff] }
 0x1c3   : > { %1023 = vmatpush.msra.mxu2 %v909_v40  ;;  %1064 = vmatpush.msra.mxu3 %v910_v41  ;;  %v898_v53 = vld [vmem:[%s2550_s2 + $0x118] sm:$0xff]  ;;  %v899_v54 = vld [vmem:[%s2550_s2 + $0x120] sm:$0xff]  ;;  %v900_v55 = vld [vmem:[%s2550_s2 + $0x128] sm:$0xff] }
 0x1c4   : > { %941 = vmatpush.msra.mxu0 %v907_v46  ;;  %982 = vmatpush.msra.mxu1 %v908_v47  ;;  %v893_v56 = vld [vmem:[%s2550_s2 + $0xf0] sm:$0xff]  ;;  %v894_v57 = vld [vmem:[%s2550_s2 + $0xf8] sm:$0xff]  ;;  %v895_v58 = vld [vmem:[%s2550_s2 + $0x100] sm:$0xff] }
 0x1c5   : > { %1024 = vmatpush.msra.mxu2 %v905_v44  ;;  %1065 = vmatpush.msra.mxu3 %v906_v45  ;;  %v896_v59 = vld [vmem:[%s2550_s2 + $0x108] sm:$0xff]  ;;  %v889_v60 = vld [vmem:[%s2550_s2 + $0xd0] sm:$0xff]  ;;  %v890_v61 = vld [vmem:[%s2550_s2 + $0xd8] sm:$0xff] }
 0x1c6   : > { %942 = vmatpush.msra.mxu0 %v903_v50  ;;  %983 = vmatpush.msra.mxu1 %v904_v51  ;;  %v891_v62 = vld [vmem:[%s2550_s2 + $0xe0] sm:$0xff]  ;;  %v892_v63 = vld [vmem:[%s2550_s2 + $0xe8] sm:$0xff]  ;;  %v885_v0 = vld [vmem:[%s2550_s2 + $0xb0] sm:$0xff] }
 0x1c7   : > { %1025 = vmatpush.msra.mxu2 %v901_v48  ;;  %1066 = vmatpush.msra.mxu3 %v902_v49  ;;  %v886_v1 = vld [vmem:[%s2550_s2 + $0xb8] sm:$0xff]  ;;  %v887_v2 = vld [vmem:[%s2550_s2 + $0xc0] sm:$0xff]  ;;  %v888_v3 = vld [vmem:[%s2550_s2 + $0xc8] sm:$0xff] }
 0x1c8   : > { %943 = vmatpush.msra.mxu0 %v899_v54  ;;  %984 = vmatpush.msra.mxu1 %v900_v55  ;;  %v881_v4 = vld [vmem:[%s2550_s2 + $0x90] sm:$0xff]  ;;  %v882_v5 = vld [vmem:[%s2550_s2 + $0x98] sm:$0xff]  ;;  %v883_v6 = vld [vmem:[%s2550_s2 + $0xa0] sm:$0xff] }
 0x1c9   : > { %1026 = vmatpush.msra.mxu2 %v897_v52  ;;  %1067 = vmatpush.msra.mxu3 %v898_v53  ;;  %v884_v7 = vld [vmem:[%s2550_s2 + $0xa8] sm:$0xff]  ;;  %v877_v8 = vld [vmem:[%s2550_s2 + $0x70] sm:$0xff]  ;;  %v878_v9 = vld [vmem:[%s2550_s2 + $0x78] sm:$0xff] }
 0x1ca   : > { %944 = vmatpush.msra.mxu0 %v895_v58  ;;  %985 = vmatpush.msra.mxu1 %v896_v59  ;;  %v879_v10 = vld [vmem:[%s2550_s2 + $0x80] sm:$0xff]  ;;  %v880_v11 = vld [vmem:[%s2550_s2 + $0x88] sm:$0xff]  ;;  %v873_v12 = vld [vmem:[%s2550_s2 + $0x50] sm:$0xff] }
 0x1cb   : > { %1027 = vmatpush.msra.mxu2 %v893_v56  ;;  %1068 = vmatpush.msra.mxu3 %v894_v57  ;;  %v874_v13 = vld [vmem:[%s2550_s2 + $0x58] sm:$0xff]  ;;  %v875_v14 = vld [vmem:[%s2550_s2 + $0x60] sm:$0xff]  ;;  %v876_v15 = vld [vmem:[%s2550_s2 + $0x68] sm:$0xff] }
 0x1cc   : > { %945 = vmatpush.msra.mxu0 %v891_v62  ;;  %986 = vmatpush.msra.mxu1 %v892_v63  ;;  %v869_v16 = vld [vmem:[%s2550_s2 + $0x30] sm:$0xff]  ;;  %v870_v17 = vld [vmem:[%s2550_s2 + $0x38] sm:$0xff]  ;;  %v871_v18 = vld [vmem:[%s2550_s2 + $0x40] sm:$0xff] }
 0x1cd   : > { %1028 = vmatpush.msra.mxu2 %v889_v60  ;;  %1069 = vmatpush.msra.mxu3 %v890_v61  ;;  %v872_v19 = vld [vmem:[%s2550_s2 + $0x48] sm:$0xff]  ;;  %v865_v20 = vld [vmem:[%s2550_s2 + $0x10] sm:$0xff]  ;;  %v866_v21 = vld [vmem:[%s2550_s2 + $0x18] sm:$0xff] }
 0x1ce   : > { %946 = vmatpush.msra.mxu0 %v887_v2  ;;  %987 = vmatpush.msra.mxu1 %v888_v3  ;;  %v855_v22 = vld [vmem:[#allocation2 + $0x30] sm:$0xff]  ;;  %v867_v23 = vld [vmem:[%s2550_s2 + $0x20] sm:$0xff]  ;;  %v868_v24 = vld [vmem:[%s2550_s2 + $0x28] sm:$0xff] }
 0x1cf   : > { %1029 = vmatpush.msra.mxu2 %v885_v0  ;;  %1070 = vmatpush.msra.mxu3 %v886_v1  ;;  %v863_v25 = vld [vmem:[%s2550_s2] sm:$0xff]  ;;  %v864_v26 = vld [vmem:[%s2550_s2 + $0x8] sm:$0xff]  ;;  %v857_v28 = vld [vmem:[#allocation2 + $0x18] sm:$0xff] }
 0x1d0   : > { %947 = vmatpush.msra.mxu0 %v883_v6  ;;  %988 = vmatpush.msra.mxu1 %v884_v7  ;;  %v856_v27 = vld [vmem:[#allocation2] sm:$0xff]  ;;  %v858_v29 = vld [vmem:[#allocation2 + $0x10] sm:$0xff]  ;;  %v859_v30 = vld [vmem:[#allocation2 + $0x8] sm:$0xff] }
 0x1d1   : > { %1030 = vmatpush.msra.mxu2 %v881_v4  ;;  %1071 = vmatpush.msra.mxu3 %v882_v5  ;;  %v860_v31 = vld [vmem:[#allocation2 + $0x20] sm:$0xff]  ;;  %v861_v32 = vld [vmem:[#allocation2 + $0x28] sm:$0xff]  ;;  %v862_v33 = vld [vmem:[#allocation2 + $0x38] sm:$0xff] }
 0x1d2   : > { %948 = vmatpush.msra.mxu0 %v879_v10  ;;  %989 = vmatpush.msra.mxu1 %v880_v11  ;;  %v927_v34 = vld [vmem:[%s2556_s20] sm:$0xf] }
 0x1d3   : > { %1031 = vmatpush.msra.mxu2 %v877_v8  ;;  %1072 = vmatpush.msra.mxu3 %v878_v9  ;;  %v2748_v35 = vperm.slane %v927_v34, 0  ;;  %v2750_v36 = vperm.slane %v927_v34, 1  ;;  %v2752_v37 = vperm.slane %v927_v34, 2  ;;  %v2754_v38 = vperm.slane %v927_v34, 3 }
 0x1d4   : > { %949 = vmatpush.msra.mxu0 %v875_v14  ;;  %990 = vmatpush.msra.mxu1 %v876_v15 }
 0x1d5   : > { %1032 = vmatpush.msra.mxu2 %v873_v12  ;;  %1073 = vmatpush.msra.mxu3 %v874_v13 }
 0x1d6   : > { %950 = vmatpush.msra.mxu0 %v871_v18  ;;  %991 = vmatpush.msra.mxu1 %v872_v19 }
 0x1d7   : > { %1033 = vmatpush.msra.mxu2 %v869_v16  ;;  %1074 = vmatpush.msra.mxu3 %v870_v17 }
 0x1d8   : > { %951 = vmatpush.msra.mxu0 %v867_v23  ;;  %992 = vmatpush.msra.mxu1 %v868_v24 }
 0x1d9   : > { %1034 = vmatpush.msra.mxu2 %v865_v20  ;;  %1075 = vmatpush.msra.mxu3 %v866_v21 }
 0x1da   : > { %1035 = vmatmul.f32.vlgmr.msra.gmra.mxu2 %v855_v22  ;;  %1076 = vmatmul.f32.vlgmr.msra.gmra.mxu3 %v855_v22 }
 0x1db   : > { %952 = vmatpush.msra.mxu0 %v863_v25  ;;  %993 = vmatpush.msra.mxu1 %v864_v26 }
 0x1dc   : > { %953 = vmatmul.f32.vlgmr.msra.gmra.mxu0 %v855_v22  ;;  %994 = vmatmul.f32.vlgmr.msra.gmra.mxu1 %v855_v22 }
 0x1e2   : > { %1038 = vmatmul.f32.gmra.mxu2 %v856_v27  ;;  %1079 = vmatmul.f32.gmra.mxu3 %v856_v27 }
 0x1e4   : > { %956 = vmatmul.f32.gmra.mxu0 %v856_v27  ;;  %997 = vmatmul.f32.gmra.mxu1 %v856_v27 }
 0x1ea   : > { %1041 = vmatmul.f32.gmra.mxu2 %v857_v28  ;;  %1082 = vmatmul.f32.gmra.mxu3 %v857_v28 }
 0x1ec   : > { %959 = vmatmul.f32.gmra.mxu0 %v857_v28  ;;  %1000 = vmatmul.f32.gmra.mxu1 %v857_v28 }
 0x1f2   : > { %1044 = vmatmul.f32.gmra.mxu2 %v858_v29  ;;  %1085 = vmatmul.f32.gmra.mxu3 %v858_v29 }
 0x1f4   : > { %962 = vmatmul.f32.gmra.mxu0 %v858_v29  ;;  %1003 = vmatmul.f32.gmra.mxu1 %v858_v29 }
 0x1fa   : > { %1047 = vmatmul.f32.gmra.mxu2 %v859_v30  ;;  %1088 = vmatmul.f32.gmra.mxu3 %v859_v30 }
 0x1fc   : > { %965 = vmatmul.f32.gmra.mxu0 %v859_v30  ;;  %1006 = vmatmul.f32.gmra.mxu1 %v859_v30 }
 0x202   : > { %1050 = vmatmul.f32.gmra.mxu2 %v860_v31  ;;  %1091 = vmatmul.f32.gmra.mxu3 %v860_v31 }
 0x204   : > { %968 = vmatmul.f32.gmra.mxu0 %v860_v31  ;;  %1009 = vmatmul.f32.gmra.mxu1 %v860_v31 }
 0x20a   : > { %1053 = vmatmul.f32.gmra.mxu2 %v861_v32  ;;  %1094 = vmatmul.f32.gmra.mxu3 %v861_v32 }
 0x20c   : > { %971 = vmatmul.f32.gmra.mxu0 %v861_v32  ;;  %1012 = vmatmul.f32.gmra.mxu1 %v861_v32 }
 0x212   : > { %1056 = vmatmul.f32.gmra.mxu2 %v862_v33  ;;  %1097 = vmatmul.f32.gmra.mxu3 %v862_v33 }
 0x214   : > { %974 = vmatmul.f32.gmra.mxu0 %v862_v33  ;;  %1015 = vmatmul.f32.gmra.mxu1 %v862_v33 }
 0x259   : > { %v954_v39 = vpop.f32.mrf.mxu0  ;;  %v995_v40 = vpop.f32.mrf.mxu1 }
 0x25a   : > { %v955_v41 = vadd.f32 %v954_v39, %v2748_v35  ;;  %v996_v42 = vadd.f32 %v995_v40, %v2750_v36 }
 0x25c   : > { %v1101_v45 = vmul.f32 0.5, %v955_v41  ;;  %v1102_v46 = vmul.f32 0.5, %v996_v42 }
 0x25d   : > { %v1036_v43 = vpop.f32.mrf.mxu2  ;;  %v1077_v44 = vpop.f32.mrf.mxu3 }
 0x25e   : > { %v1037_v47 = vadd.f32 %v1036_v43, %v2752_v37  ;;  %v1078_v48 = vadd.f32 %v1077_v44, %v2754_v38  ;;  %1768 = vtanh.f32 %v1101_v45 }
 0x25f   : > { %1770 = vtanh.f32 %v1102_v46 }
 0x260   : > { %v1103_v49 = vmul.f32 0.5, %v1037_v47  ;;  %v1104_v50 = vmul.f32 0.5, %v1078_v48 }
 0x261   : > { %v957_v51 = vpop.f32.mrf.mxu0  ;;  %v998_v52 = vpop.f32.mrf.mxu1 }
 0x262   : > { %1772 = vtanh.f32 %v1103_v49  ;;  %v958_v53 = vadd.f32 %v957_v51, %v2748_v35  ;;  %v999_v54 = vadd.f32 %v998_v52, %v2750_v36 }
 0x263   : > { %1774 = vtanh.f32 %v1104_v50 }
 0x264   : > { %v1769_v57 = vpop.eup %1768  ;;  %v1105_v58 = vmul.f32 0.5, %v958_v53  ;;  %v1106_v59 = vmul.f32 0.5, %v999_v54 }
 0x265   : > { %v1039_v55 = vpop.f32.mrf.mxu2  ;;  %v1080_v56 = vpop.f32.mrf.mxu3  ;;  %v1165_v63 = vadd.f32 1.0, %v1769_v57 }
 0x266   : > { %v1040_v60 = vadd.f32 %v1039_v55, %v2752_v37  ;;  %v1081_v61 = vadd.f32 %v1080_v56, %v2754_v38  ;;  %v1771_v62 = vpop.eup %1770  ;;  %1776 = vtanh.f32 %v1105_v58 }
 0x267   : > { %v1166_v1 = vadd.f32 1.0, %v1771_v62  ;;  %v1197_v5 = vmul.f32 0.5, %v1165_v63  ;;  %1778 = vtanh.f32 %v1106_v59 }
 0x268   : > { %v1773_v0 = vpop.eup %1772  ;;  %v1107_v2 = vmul.f32 0.5, %v1040_v60  ;;  %v1108_v3 = vmul.f32 0.5, %v1081_v61 }
 0x269   : > { %v1775_v4 = vpop.eup %1774  ;;  %v1167_v6 = vadd.f32 1.0, %v1773_v0  ;;  %v1198_v7 = vmul.f32 0.5, %v1166_v1  ;;  %1229 = vst [vmem:[%s2568_s7] sm:$0xff] %v1197_v5  ;;  %v960_v10 = vpop.f32.mrf.mxu0 }
 0x26a   : > { %v1168_v8 = vadd.f32 1.0, %v1775_v4  ;;  %1780 = vtanh.f32 %v1107_v2  ;;  %v1001_v11 = vpop.f32.mrf.mxu1  ;;  %v961_v13 = vadd.f32 %v960_v10, %v2748_v35 }
 0x26b   : > { %v1199_v9 = vmul.f32 0.5, %v1167_v6  ;;  %1782 = vtanh.f32 %v1108_v3  ;;  %1230 = vst [vmem:[%s2568_s7 + $0x8] sm:$0xff] %v1198_v7  ;;  %v1002_v14 = vadd.f32 %v1001_v11, %v2750_v36 }
 0x26c   : > { %v1200_v12 = vmul.f32 0.5, %v1168_v8  ;;  %v1777_v17 = vpop.eup %1776  ;;  %v1109_v18 = vmul.f32 0.5, %v961_v13 }
 0x26d   : > { %1231 = vst [vmem:[%s2568_s7 + $0x10] sm:$0xff] %v1199_v9  ;;  %v1042_v15 = vpop.f32.mrf.mxu2  ;;  %v1083_v16 = vpop.f32.mrf.mxu3  ;;  %v1110_v19 = vmul.f32 0.5, %v1002_v14  ;;  %v1169_v23 = vadd.f32 1.0, %v1777_v17 }
 0x26e   : > { %1232 = vst [vmem:[%s2568_s7 + $0x18] sm:$0xff] %v1200_v12  ;;  %v1043_v20 = vadd.f32 %v1042_v15, %v2752_v37  ;;  %v1084_v21 = vadd.f32 %v1083_v16, %v2754_v38  ;;  %v1779_v22 = vpop.eup %1778  ;;  %1784 = vtanh.f32 %v1109_v18 }
 0x26f   : > { %v1170_v25 = vadd.f32 1.0, %v1779_v22  ;;  %v1201_v29 = vmul.f32 0.5, %v1169_v23  ;;  %1786 = vtanh.f32 %v1110_v19 }
 0x270   : > { %v1781_v24 = vpop.eup %1780  ;;  %v1111_v26 = vmul.f32 0.5, %v1043_v20  ;;  %v1112_v27 = vmul.f32 0.5, %v1084_v21 }
 0x271   : > { %v1783_v28 = vpop.eup %1782  ;;  %v1171_v30 = vadd.f32 1.0, %v1781_v24  ;;  %v1202_v31 = vmul.f32 0.5, %v1170_v25  ;;  %1233 = vst [vmem:[%s2568_s7 + $0x20] sm:$0xff] %v1201_v29  ;;  %v963_v34 = vpop.f32.mrf.mxu0 }
 0x272   : > { %v1172_v32 = vadd.f32 1.0, %v1783_v28  ;;  %1788 = vtanh.f32 %v1111_v26  ;;  %v1004_v39 = vpop.f32.mrf.mxu1  ;;  %v964_v41 = vadd.f32 %v963_v34, %v2748_v35 }
 0x273   : > { %v1203_v33 = vmul.f32 0.5, %v1171_v30  ;;  %1790 = vtanh.f32 %v1112_v27  ;;  %1234 = vst [vmem:[%s2568_s7 + $0x28] sm:$0xff] %v1202_v31  ;;  %v1005_v42 = vadd.f32 %v1004_v39, %v2750_v36 }
 0x274   : > { %v1204_v40 = vmul.f32 0.5, %v1172_v32  ;;  %v1785_v45 = vpop.eup %1784  ;;  %v1113_v46 = vmul.f32 0.5, %v964_v41 }
 0x275   : > { %1235 = vst [vmem:[%s2568_s7 + $0x30] sm:$0xff] %v1203_v33  ;;  %v1045_v43 = vpop.f32.mrf.mxu2  ;;  %v1086_v44 = vpop.f32.mrf.mxu3  ;;  %v1114_v47 = vmul.f32 0.5, %v1005_v42  ;;  %v1173_v51 = vadd.f32 1.0, %v1785_v45 }
 0x276   : > { %1236 = vst [vmem:[%s2568_s7 + $0x38] sm:$0xff] %v1204_v40  ;;  %v1046_v48 = vadd.f32 %v1045_v43, %v2752_v37  ;;  %v1087_v49 = vadd.f32 %v1086_v44, %v2754_v38  ;;  %v1787_v50 = vpop.eup %1786  ;;  %1792 = vtanh.f32 %v1113_v46 }
 0x277   : > { %v1174_v53 = vadd.f32 1.0, %v1787_v50  ;;  %v1205_v57 = vmul.f32 0.5, %v1173_v51  ;;  %1794 = vtanh.f32 %v1114_v47 }
 0x278   : > { %v1789_v52 = vpop.eup %1788  ;;  %v1115_v54 = vmul.f32 0.5, %v1046_v48  ;;  %v1116_v55 = vmul.f32 0.5, %v1087_v49 }
 0x279   : > { %v1791_v56 = vpop.eup %1790  ;;  %v1175_v58 = vadd.f32 1.0, %v1789_v52  ;;  %v1206_v59 = vmul.f32 0.5, %v1174_v53  ;;  %1237 = vst [vmem:[%s2568_s7 + $0x40] sm:$0xff] %v1205_v57  ;;  %v966_v62 = vpop.f32.mrf.mxu0 }
 0x27a   : > { %v1176_v60 = vadd.f32 1.0, %v1791_v56  ;;  %1796 = vtanh.f32 %v1115_v54  ;;  %v1007_v63 = vpop.f32.mrf.mxu1  ;;  %v967_v1 = vadd.f32 %v966_v62, %v2748_v35 }
 0x27b   : > { %v1207_v61 = vmul.f32 0.5, %v1175_v58  ;;  %1798 = vtanh.f32 %v1116_v55  ;;  %1238 = vst [vmem:[%s2568_s7 + $0x48] sm:$0xff] %v1206_v59  ;;  %v1008_v2 = vadd.f32 %v1007_v63, %v2750_v36 }
 0x27c   : > { %v1208_v0 = vmul.f32 0.5, %v1176_v60  ;;  %v1793_v5 = vpop.eup %1792  ;;  %v1117_v6 = vmul.f32 0.5, %v967_v1 }
 0x27d   : > { %1239 = vst [vmem:[%s2568_s7 + $0x50] sm:$0xff] %v1207_v61  ;;  %v1048_v3 = vpop.f32.mrf.mxu2  ;;  %v1089_v4 = vpop.f32.mrf.mxu3  ;;  %v1118_v7 = vmul.f32 0.5, %v1008_v2  ;;  %v1177_v11 = vadd.f32 1.0, %v1793_v5 }
 0x27e   : > { %1240 = vst [vmem:[%s2568_s7 + $0x58] sm:$0xff] %v1208_v0  ;;  %v1049_v8 = vadd.f32 %v1048_v3, %v2752_v37  ;;  %v1090_v9 = vadd.f32 %v1089_v4, %v2754_v38  ;;  %v1795_v10 = vpop.eup %1794  ;;  %1800 = vtanh.f32 %v1117_v6 }
 0x27f   : > { %v1178_v13 = vadd.f32 1.0, %v1795_v10  ;;  %v1209_v17 = vmul.f32 0.5, %v1177_v11  ;;  %1802 = vtanh.f32 %v1118_v7 }
 0x280   : > { %v1797_v12 = vpop.eup %1796  ;;  %v1119_v14 = vmul.f32 0.5, %v1049_v8  ;;  %v1120_v15 = vmul.f32 0.5, %v1090_v9 }
 0x281   : > { %v1799_v16 = vpop.eup %1798  ;;  %v1179_v18 = vadd.f32 1.0, %v1797_v12  ;;  %v1210_v19 = vmul.f32 0.5, %v1178_v13  ;;  %1241 = vst [vmem:[%s2568_s7 + $0x60] sm:$0xff] %v1209_v17  ;;  %v969_v22 = vpop.f32.mrf.mxu0 }
 0x282   : > { %v1180_v20 = vadd.f32 1.0, %v1799_v16  ;;  %1804 = vtanh.f32 %v1119_v14  ;;  %v1010_v23 = vpop.f32.mrf.mxu1  ;;  %v970_v25 = vadd.f32 %v969_v22, %v2748_v35 }
 0x283   : > { %v1211_v21 = vmul.f32 0.5, %v1179_v18  ;;  %1806 = vtanh.f32 %v1120_v15  ;;  %1242 = vst [vmem:[%s2568_s7 + $0x68] sm:$0xff] %v1210_v19  ;;  %v1011_v26 = vadd.f32 %v1010_v23, %v2750_v36 }
 0x284   : > { %v1212_v24 = vmul.f32 0.5, %v1180_v20  ;;  %v1801_v29 = vpop.eup %1800  ;;  %v1121_v30 = vmul.f32 0.5, %v970_v25 }
 0x285   : > { %1243 = vst [vmem:[%s2568_s7 + $0x70] sm:$0xff] %v1211_v21  ;;  %v1051_v27 = vpop.f32.mrf.mxu2  ;;  %v1092_v28 = vpop.f32.mrf.mxu3  ;;  %v1122_v31 = vmul.f32 0.5, %v1011_v26  ;;  %v1181_v39 = vadd.f32 1.0, %v1801_v29 }
 0x286   : > { %1244 = vst [vmem:[%s2568_s7 + $0x78] sm:$0xff] %v1212_v24  ;;  %v1052_v32 = vadd.f32 %v1051_v27, %v2752_v37  ;;  %v1093_v33 = vadd.f32 %v1092_v28, %v2754_v38  ;;  %v1803_v34 = vpop.eup %1802  ;;  %1808 = vtanh.f32 %v1121_v30 }
 0x287   : > { %v1182_v41 = vadd.f32 1.0, %v1803_v34  ;;  %v1213_v45 = vmul.f32 0.5, %v1181_v39  ;;  %1810 = vtanh.f32 %v1122_v31 }
 0x288   : > { %v1805_v40 = vpop.eup %1804  ;;  %v1123_v42 = vmul.f32 0.5, %v1052_v32  ;;  %v1124_v43 = vmul.f32 0.5, %v1093_v33 }
 0x289   : > { %v1807_v44 = vpop.eup %1806  ;;  %v1183_v46 = vadd.f32 1.0, %v1805_v40  ;;  %v1214_v47 = vmul.f32 0.5, %v1182_v41  ;;  %1245 = vst [vmem:[%s2568_s7 + $0x80] sm:$0xff] %v1213_v45  ;;  %v972_v50 = vpop.f32.mrf.mxu0 }
 0x28a   : > { %v1184_v48 = vadd.f32 1.0, %v1807_v44  ;;  %1812 = vtanh.f32 %v1123_v42  ;;  %v1013_v51 = vpop.f32.mrf.mxu1  ;;  %v973_v53 = vadd.f32 %v972_v50, %v2748_v35 }
 0x28b   : > { %v1215_v49 = vmul.f32 0.5, %v1183_v46  ;;  %1814 = vtanh.f32 %v1124_v43  ;;  %1246 = vst [vmem:[%s2568_s7 + $0x88] sm:$0xff] %v1214_v47  ;;  %v1014_v54 = vadd.f32 %v1013_v51, %v2750_v36 }
 0x28c   : > { %v1216_v52 = vmul.f32 0.5, %v1184_v48  ;;  %v1809_v57 = vpop.eup %1808  ;;  %v1125_v58 = vmul.f32 0.5, %v973_v53 }
 0x28d   : > { %1247 = vst [vmem:[%s2568_s7 + $0x90] sm:$0xff] %v1215_v49  ;;  %v1054_v55 = vpop.f32.mrf.mxu2  ;;  %v1095_v56 = vpop.f32.mrf.mxu3  ;;  %v1126_v59 = vmul.f32 0.5, %v1014_v54  ;;  %v1185_v63 = vadd.f32 1.0, %v1809_v57 }
 0x28e   : > { %1248 = vst [vmem:[%s2568_s7 + $0x98] sm:$0xff] %v1216_v52  ;;  %v1055_v60 = vadd.f32 %v1054_v55, %v2752_v37  ;;  %v1096_v61 = vadd.f32 %v1095_v56, %v2754_v38  ;;  %v1811_v62 = vpop.eup %1810  ;;  %1816 = vtanh.f32 %v1125_v58 }
 0x28f   : > { %v1186_v1 = vadd.f32 1.0, %v1811_v62  ;;  %v1217_v5 = vmul.f32 0.5, %v1185_v63  ;;  %1818 = vtanh.f32 %v1126_v59 }
 0x290   : > { %v1813_v0 = vpop.eup %1812  ;;  %v1127_v2 = vmul.f32 0.5, %v1055_v60  ;;  %v1128_v3 = vmul.f32 0.5, %v1096_v61 }
 0x291   : > { %v1815_v4 = vpop.eup %1814  ;;  %v1187_v6 = vadd.f32 1.0, %v1813_v0  ;;  %v1218_v7 = vmul.f32 0.5, %v1186_v1  ;;  %1249 = vst [vmem:[%s2568_s7 + $0xa0] sm:$0xff] %v1217_v5  ;;  %v975_v10 = vpop.f32.mrf.mxu0 }
 0x292   : > { %v1188_v8 = vadd.f32 1.0, %v1815_v4  ;;  %1820 = vtanh.f32 %v1127_v2  ;;  %v1016_v11 = vpop.f32.mrf.mxu1  ;;  %v976_v13 = vadd.f32 %v975_v10, %v2748_v35 }
 0x293   : > { %v1219_v9 = vmul.f32 0.5, %v1187_v6  ;;  %1822 = vtanh.f32 %v1128_v3  ;;  %1250 = vst [vmem:[%s2568_s7 + $0xa8] sm:$0xff] %v1218_v7  ;;  %v1017_v14 = vadd.f32 %v1016_v11, %v2750_v36 }
 0x294   : > { %v1220_v12 = vmul.f32 0.5, %v1188_v8  ;;  %v1817_v17 = vpop.eup %1816  ;;  %v1129_v18 = vmul.f32 0.5, %v976_v13 }
 0x295   : > { %1251 = vst [vmem:[%s2568_s7 + $0xb0] sm:$0xff] %v1219_v9  ;;  %v1057_v15 = vpop.f32.mrf.mxu2  ;;  %v1098_v16 = vpop.f32.mrf.mxu3  ;;  %v1130_v19 = vmul.f32 0.5, %v1017_v14  ;;  %v1189_v23 = vadd.f32 1.0, %v1817_v17 }
 0x296   : > { %1252 = vst [vmem:[%s2568_s7 + $0xb8] sm:$0xff] %v1220_v12  ;;  %v1058_v20 = vadd.f32 %v1057_v15, %v2752_v37  ;;  %v1099_v21 = vadd.f32 %v1098_v16, %v2754_v38  ;;  %v1819_v22 = vpop.eup %1818  ;;  %1824 = vtanh.f32 %v1129_v18 }
 0x297   : > { %v1190_v25 = vadd.f32 1.0, %v1819_v22  ;;  %v1221_v27 = vmul.f32 0.5, %v1189_v23  ;;  %1826 = vtanh.f32 %v1130_v19 }
 0x298   : > { %v1821_v24 = vpop.eup %1820  ;;  %v1131_v35 = vmul.f32 0.5, %v1058_v20  ;;  %v1132_v36 = vmul.f32 0.5, %v1099_v21 }
 0x299   : > { %v1823_v26 = vpop.eup %1822  ;;  %v1191_v28 = vadd.f32 1.0, %v1821_v24  ;;  %v1222_v29 = vmul.f32 0.5, %v1190_v25  ;;  %1253 = vst [vmem:[%s2568_s7 + $0xc0] sm:$0xff] %v1221_v27 }
 0x29a   : > { %v1192_v30 = vadd.f32 1.0, %v1823_v26  ;;  %1828 = vtanh.f32 %v1131_v35 }
 0x29b   : > { %v1223_v37 = vmul.f32 0.5, %v1191_v28  ;;  %1830 = vtanh.f32 %v1132_v36  ;;  %1254 = vst [vmem:[%s2568_s7 + $0xc8] sm:$0xff] %v1222_v29 }
 0x29c   : > { %v1224_v38 = vmul.f32 0.5, %v1192_v30  ;;  %v1825_v31 = vpop.eup %1824 }
 0x29d   : > { %1255 = vst [vmem:[%s2568_s7 + $0xd0] sm:$0xff] %v1223_v37  ;;  %v1827_v32 = vpop.eup %1826  ;;  %v1193_v33 = vadd.f32 1.0, %v1825_v31 }
 0x29e   : > { %1256 = vst [vmem:[%s2568_s7 + $0xd8] sm:$0xff] %v1224_v38  ;;  %v1194_v39 = vadd.f32 1.0, %v1827_v32 }
 0x29f   : > { %v1225_v41 = vmul.f32 0.5, %v1193_v33 }
 0x2a0   : > { %v1829_v34 = vpop.eup %1828  ;;  %v1226_v43 = vmul.f32 0.5, %v1194_v39 }
 0x2a1   : > { %v1831_v40 = vpop.eup %1830  ;;  %v1195_v42 = vadd.f32 1.0, %v1829_v34  ;;  %1257 = vst [vmem:[%s2568_s7 + $0xe0] sm:$0xff] %v1225_v41 }
 0x2a2   : > { %v1196_v44 = vadd.f32 1.0, %v1831_v40  ;;  %1258 = vst [vmem:[%s2568_s7 + $0xe8] sm:$0xff] %v1226_v43 }
 0x2a3   : > { %v1227_v45 = vmul.f32 0.5, %v1195_v42 }
 0x2a4   : > { %v1228_v46 = vmul.f32 0.5, %v1196_v44 }
 0x2a5   : > { %1259 = vst [vmem:[%s2568_s7 + $0xf0] sm:$0xff] %v1227_v45 }
 0x2a6   : > { %1260 = vst [vmem:[%s2568_s7 + $0xf8] sm:$0xff] %v1228_v46 }
 0x2a7 PF: > { %s3041_s22 = sld [smem:[#allocation28_spill]]  ;;  %s1285_s3 = sshll.u32 %s2568_s7, 4  ;;  %s2823_s3 = int_to_ptr.vmem [resolvable:$true] %s1285_s3 }
 0x2a8   : > { %s3042_s9 = sld [smem:[#allocation29_spill]]  ;;  %s1302_s29 = sshll.u32 %s2570_s13, 4  ;;  %s2832_s29 = int_to_ptr.vmem [resolvable:$true] %s1302_s29 }
 0x2a9   : > { %s3045_s19 = sld [smem:[#allocation50_spill]] }
 0x2aa   : > { %s3046_s30 = sld [smem:[#allocation49_spill]] }
 0x2ad   : > { %s1532_s24 = sadd.s32 4294967294, %s3041_s22  ;;  %s1262_s22 = scalar_lea.sflag [#allocation5], %s448_s1 }
 0x2ae   : > { %p1275_p12 = scmp.gt.s32.totalorder %s1532_s24, 0  ;;  %s1544_s6 = sshll.u32 %s3042_s9, 6 }
 0x2af   : > { %s1301_s14 = scalar_lea.hbm %s3045_s19, %s1544_s6 }
 0x2b0   : > { %s3097_s24 = smov (!%p1275_p12, %s1532_s24), 0  ;;  %s3047_s0 = smov %s3046_s30 }
 0x2b1   : > { %s1534_s17 = sshll.u32 %s3097_s24, 2  ;;  %s1304_s7 = sshll.u32 %s1301_s14, 4  ;;  %s1305_s7 = int_to_ptr.hbm [resolvable:$true] %s1304_s7 }
 0x2b2   : > { %s1282_s12 = sadd.s32 %s1544_s6, %s1534_s17 }
 0x2b3   : > { %s1536_s20 = sshll.u32 %s1282_s12, 3  ;;  %s1972_s12 = scalar_lea.hbm %s3047_s0, 2048 }
 0x2b4   : > { %s1284_s11 = scalar_lea.hbm %s3046_s30, %s1536_s20 }
 0x2b5   : > { %s1287_s15 = sshll.u32 %s1284_s11, 4  ;;  %s1288_s15 = int_to_ptr.hbm [resolvable:$true] %s1287_s15 }
 0x2b6   : > { %s1966_s9 = sshra.s32 %s1288_s15, 4  ;;  %s1967_s9 = int_to_ptr.hbm [resolvable:$true] %s1966_s9 }
 0x2b7   : > { %s1968_s24 = scalar_lea.hbm %s1967_s9, 256  ;;  %p1973_p4 = scmp.lt.s32.totalorder %s1967_s9, %s3047_s0 }
 0x2b8   : > { %p1969_p1 = scmp.ne.s32.totalorder %s1967_s9, %s1968_s24  ;;  %p1974_p9 = scmp.lt.s32.totalorder %s1972_s12, %s1968_s24 }
 0x2ba   : > { %p1970_p10 = pnand %p1969_p1, %p2392_p0  ;;  %p1975_p3 = por %p1974_p9, %p1973_p4 }
 0x2bc   : > { %p1971_p11 = pneg %p1970_p10 }
 0x2be   : > { %p1976_p7 = pnand %p1975_p3, %p1971_p11 }
 0x2c0   : > { %1979 = shalt.err (!%p1976_p7)
}
 0x2c1   : > { %s2198_s1 = smov 512   ;;  %s2199_s4 = smov 1024  }
 0x2c2   : > { %s2200_s14 = smov 32   ;;  %s1267_s25 = scalar_lea.sflag [#allocation13], %s455_s8 }
 0x2c3   : > { %1554 = dma.vmem_to_hbm [thread:$0]  (%p2392_p0), %s2823_s3, 4096, %s1288_s15, %s1262_s22, %s2198_s1, %s2199_s4, %s2200_s14  }
 0x2c4   : > { %s1994_s18 = sshra.s32 %s1305_s7, 4  ;;  %s2000_s24 = scalar_lea.hbm %s3045_s19, 256  ;;  %s1995_s18 = int_to_ptr.hbm [resolvable:$true] %s1994_s18 }
 0x2c5   : > { %s1996_s30 = scalar_lea.hbm %s1995_s18, 64  ;;  %p2001_p6 = scmp.lt.s32.totalorder %s1995_s18, %s3045_s19 }
 0x2c6   : > { %p1997_p8 = scmp.ne.s32.totalorder %s1995_s18, %s1996_s30  ;;  %p2002_p12 = scmp.lt.s32.totalorder %s2000_s24, %s1996_s30 }
 0x2c8   : > { %p1998_p5 = pnand %p1997_p8, %p2404_p2  ;;  %p2003_p0 = por %p2002_p12, %p2001_p6 }
 0x2ca   : > { %p1999_p13 = pneg %p1998_p5 }
 0x2cc   : > { %p2004_p1 = pnand %p2003_p0, %p1999_p13 }
 0x2ce   : > { %2007 = shalt.err (!%p2004_p1)
}
 0x2cf   : > { %s2201_s8 = smov 128   ;;  %s2202_s3 = smov 8  }
 0x2d0   : > { %1555 = dma.vmem_to_hbm [thread:$0]  (%p2404_p2), %s2832_s29, 1024, %s1305_s7, %s1267_s25, %s2201_s8, %s2201_s8, %s2202_s3  }
 0x2d1 PF: > { %s3050_s2 = sld [smem:[#allocation22_spill]]  ;;  %p1579_p10 = scmp.ge.s32.totalorder %s2190_s16, 2 }
 0x2d2   : > { %s3051_s15 = sld [smem:[#allocation36_spill]] }
 0x2d7   : > { %s1319_s22 = sand.u32 1, %s3050_s2  }
 0x2d8   : > { %p3052_p11 = scmp.ne.s32.totalorder %s3051_s15, 0  ;;  %s1320_s12 = scalar_lea.sflag [#allocation5], %s1319_s22 }
 0x2da   : > { %p1572_p4 = pnand %p1579_p10, %p3052_p11 }
 0x2dc   : > { %p1573_p9 = pneg %p1572_p4 }
 0x2de   : > { %2105 = dma.done.wait (%p1573_p9), %s1320_s12, 4096  }
 0x2df   : > { %2107 = vsyncadd (%p1573_p9), %s1320_s12, 4294963200  ;;  %s3053_s20 = sld [smem:[#allocation20_spill]] }
 0x2e0   : > { %s3054_s13 = sld [smem:[#allocation38_spill]] }
 0x2e5   : > { %s1329_s1 = sand.u32 1, %s3053_s20  }
 0x2e6   : > { %p3055_p3 = scmp.ne.s32.totalorder %s3054_s13, 0  ;;  %s1330_s27 = scalar_lea.sflag [#allocation13], %s1329_s1 }
 0x2e8   : > { %p1575_p7 = pnand %p1579_p10, %p3055_p3 }
 0x2ea   : > { %p1576_p8 = pneg %p1575_p7 }
 0x2ec   : > { %2109 = dma.done.wait (%p1576_p8), %s1330_s27, 1024  }
 0x2ed   : > { %2111 = vsyncadd (%p1576_p8), %s1330_s27, 4294966272  ;;  %s32_s16 = sadd.s32 1, %s2190_s16   ;;  %s3057_s7 = sld [smem:[#allocation21_spill]] }
 0x2ee   : > { %p2868_p2 = scmp.ge.s32.totalorder %s32_s16, 18   ;;  %s3058_s5 = smov %s2465_s21 }
 0x2ef   : > { %s3059_s24 = sld [smem:[#allocation23_spill]]  ;;  %s3071_s22 = smov %s2122_s23 }
 0x2f0   : > { %s3060_s4 = sld [smem:[#allocation43_spill]]  ;;  %s3073_s23 = smov %s3058_s5 }
 0x2f1   : > { %s3061_s14 = sld [smem:[#allocation24_spill]]  ;;  %s3075_s25 = smov %s2134_s26 }
 0x2f2   : > { %s3062_s18 = sld [smem:[#allocation42_spill]]  ;;  %s3078_s27 = smov %s2142_s28 }
 0x2f3   : > { %s3063_s30 = sld [smem:[#allocation25_spill]]  ;;  %s3069_s21 = smov %s3057_s7 }
 0x2f4   : > { %s3064_s11 = sld [smem:[#allocation26_spill]]  ;;  %s3082_s9 = smov %s2166_s10 }
 0x2f5   : > { %s3065_s8 = sld [smem:[#allocation34_spill]] }
 0x2f6   : > { %s3066_s6 = sld [smem:[#allocation27_spill]]  ;;  %s3077_s26 = smov %s3060_s4 }
 0x2f7   : > { %s3067_s17 = sld [smem:[#allocation41_spill]]  ;;  %s3079_s28 = smov %s3061_s14 }
 0x2f8   : > { %s3068_s12 = sld [smem:[#allocation30_spill]]  ;;  %s3080_s29 = smov %s3062_s18 }
 0x2f9   : > { %s3070_s13 = sld [smem:[#allocation31_spill]] }
 0x2fa   : > { %s3072_s3 = sld [smem:[#allocation32_spill]]  ;;  %s3081_s7 = smov %s3064_s11 }
 0x2fb   : > { %s3074_s15 = sld [smem:[#allocation39_spill]] }
 0x2fc   : > { %s3083_s10 = smov %s3066_s6  ;;  %31 = sbr.rel (!%p2868_p2) target bundleno = 27 (0x1b), region = 155 }
 0x2fd   : > { %s3084_s11 = smov %s3067_s17 }
 0x300   : > { %s3085_s14 = smov %s3072_s3 }
 0x301   :  { %1336 = vsyncpa [#allocation4], 1 }
 0x302   :  { %1338 = vsyncpa [#allocation4 + $0x1], 1 }
 0x303   :  { %1339 = vsyncpa [#allocation7], 1 }
 0x304   :  { %1341 = vsyncpa [#allocation7 + $0x1], 1 }
 0x305   :  { %1342 = vsyncpa [#allocation10], 1 }
 0x306   :  { %1344 = vsyncpa [#allocation10 + $0x1], 1 }
 0x307   :  { %1345 = vsyncpa [#allocation5], 1 }
 0x308   :  { %1347 = vsyncpa [#allocation5 + $0x1], 1 }
 0x309   :  { %1348 = vsyncpa [#allocation13], 1 }
 0x30a   :  { %1350 = vsyncpa [#allocation13 + $0x1], 1 }

</bundles_post_ra>
